<compile_context>
chip_gen: v6e
topology: v6e:2x2x1
jax: 0.10.0
libtpu: 0.0.40
codegen_flags: <defaults>
</compile_context>

<pallas_src>
import functools

import numpy as np
import jax
import jax.numpy as jnp
from jax.experimental import pallas as pl
from jax.experimental.pallas import tpu as pltpu

MXU_DTYPE = jnp.bfloat16   # MXU operand / activation dtype (accumulation f32)
_K = 5                     # LeNet conv kernel size


# ------------------------------ Pallas kernel -------------------------------

def _sigmoid(z):
    # tanh form: one EUP transcendental per element (vs exp + reciprocal).
    return 0.5 + 0.5 * jnp.tanh(0.5 * z)


def _lenet5_kernel(x_ref, t1_ref, b1_ref, aw1_ref,
                   t2_ref, b2_ref, aw2_ref,
                   t3_ref, b3_ref,
                   wd_ref, bd_ref, wo_ref, bo_ref, out_ref):
    tb = x_ref.shape[1]

    def conv_sigmoid(act, t_ref, b_ref):
        """act: (H_in, TB, W_in*IC) bf16, lanes channel-minor.
        Returns sigmoid(conv + bias): (H_out*TB, Wo*OC) f32, rows (h, b)."""
        h_in, _, wc = act.shape
        h_out = h_in - (_K - 1)
        # K-fold: concatenate the 5 kh-shifted windows along lanes -> ONE dot.
        parts = [act[d:d + h_out].reshape(h_out * tb, wc) for d in range(_K)]
        lhs = jnp.concatenate(parts, axis=-1)            # (H_out*TB, K*W_in*IC)
        z = jnp.dot(lhs, t_ref[...], preferred_element_type=jnp.float32)
        return _sigmoid(z + b_ref[...])

    def avg_pool(y, h_out, aw_ref):
        """y: (H_out*TB, Wo*OC) f32 -> (H_out//2, TB, (Wo//2)*OC) bf16.
        H-pool is a VPU add of adjacent row-pairs; W-pool is a tiny
        channel-minor matmul (0.25 averaging weight folded in)."""
        wc = y.shape[-1]
        y = y.reshape(h_out // 2, 2, tb, wc)
        y = (y[:, 0] + y[:, 1]).astype(MXU_DTYPE)        # H-pool (VPU)
        y = y.reshape((h_out // 2) * tb, wc)
        y = jnp.dot(y, aw_ref[...], preferred_element_type=jnp.float32)
        return y.astype(MXU_DTYPE).reshape(h_out // 2, tb, aw_ref.shape[-1])

    act = x_ref[...]                                     # (32, TB, 32) bf16

    # conv1 (1->6, k5) + sigmoid + 2x2 avg-pool
    y = conv_sigmoid(act, t1_ref, b1_ref)                # (28*TB, 168)
    y = avg_pool(y, 28, aw1_ref)                         # (14, TB, 84)

    # conv2 (6->16, k5) + sigmoid + 2x2 avg-pool
    y = conv_sigmoid(y, t2_ref, b2_ref)                  # (10*TB, 160)
    y = avg_pool(y, 10, aw2_ref)                         # (5, TB, 80)

    # conv3 (16->120, k5) + sigmoid; spatial output is 1x1 -> rows are batch
    y = conv_sigmoid(y, t3_ref, b3_ref)                  # (TB, 120) == flatten

    # dense1 (120->84) + sigmoid, output (84->128-padded classes)
    y = _sigmoid(jnp.dot(y.astype(MXU_DTYPE), wd_ref[...],
                         preferred_element_type=jnp.float32) + bd_ref[...])
    y = jnp.dot(y.astype(MXU_DTYPE), wo_ref[...],
                preferred_element_type=jnp.float32) + bo_ref[...]
    out_ref[...] = y.astype(out_ref.dtype)               # lane-dense (TB, 128)


# ------------------------- host-side weight plumbing -------------------------

def _conv_toeplitz(weight, w_in):
    """torch conv weight (OC, IC, KH, KW) -> folded banded matrix
    (KH*W_in*IC, Wo*OC) with row index (kh, w, ic) and col index (j, oc):
    T[kh*W*IC + w*IC + ic, j*OC + oc] = weight[oc, ic, kh, w-j], 0 <= w-j < K."""
    oc, ic, kh, kw = weight.shape
    wo = w_in - kw + 1
    ind = np.zeros((w_in, wo, kw), np.float32)
    for j in range(wo):
        for dj in range(kw):
            ind[j + dj, j, dj] = 1.0
    wt = jnp.transpose(weight, (2, 3, 1, 0)).astype(jnp.float32)   # (kh, kw, ic, oc)
    t = jnp.einsum('wjd,edio->ewijo', jnp.asarray(ind), wt)        # (K, W, IC, Wo, OC)
    return t.reshape(kh * w_in * ic, wo * oc)


def _col_pool_matrix(w_out, oc):
    """(w_out*oc, (w_out//2)*oc): 2x avg-pool along W, channel-minor lanes.
    Entries are 0.25 so the preceding raw H-pool add is averaged too."""
    wp = w_out // 2
    a = np.zeros((w_out * oc, wp * oc), np.float32)
    for j in range(wp):
        for c in range(oc):
            a[(2 * j) * oc + c, j * oc + c] = 0.25
            a[(2 * j + 1) * oc + c, j * oc + c] = 0.25
    return a


def _choose_tiling(batch, max_tb):
    """Pick (batch_tile, padded_batch).  Tiles are multiples of 16 (dense bf16
    sublane tiles); prefer an even number of grid steps >= 2 so v7x can shard
    the batch grid across its two TensorCores."""
    if batch < 16:
        return batch, batch                       # single tiny step
    max_tb = max(16, max_tb)
    padded = -(-batch // 16) * 16
    divisors = [t for t in range(16, padded + 1, 16)
                if padded % t == 0 and t <= max_tb]
    even = [t for t in divisors if (padded // t) % 2 == 0]
    tb = max(even) if even else max(divisors)
    return tb, padded


# --------------------------------- wrapper ----------------------------------

@functools.partial(jax.jit, static_argnames=("max_tb",))
def lenet5_forward(x_nchw, params, *, max_tb=128):
    """x_nchw: (B, 1, 32, 32) float32 -> logits (B, classes) float32."""
    batch = x_nchw.shape[0]
    assert x_nchw.shape[1:] == (1, 32, 32), "LeNet5 expects (B, 1, 32, 32)"
    classes = params["out_w"].shape[0]
    ncls = max(128, -(-classes // 128) * 128)     # lane-dense output width
    tb, padded = _choose_tiling(batch, max_tb)
    steps = padded // tb

    # (B,1,32,32) -> (32, B_pad, 32) bf16: leading dim = H, then batch, lanes = W.
    x3 = x_nchw.reshape(batch, 32, 32).astype(MXU_DTYPE)
    if padded != batch:
        x3 = jnp.pad(x3, ((0, padded - batch), (0, 0), (0, 0)))
    x3 = jnp.transpose(x3, (1, 0, 2))

    wdt = MXU_DTYPE
    t1 = _conv_toeplitz(params["conv1_w"], 32).astype(wdt)     # (160, 168)
    t2 = _conv_toeplitz(params["conv2_w"], 14).astype(wdt)     # (420, 160)
    t3 = _conv_toeplitz(params["conv3_w"], 5).astype(wdt)      # (400, 120)
    b1 = jnp.tile(params["conv1_b"], 28).reshape(1, -1).astype(jnp.float32)
    b2 = jnp.tile(params["conv2_b"], 10).reshape(1, -1).astype(jnp.float32)
    b3 = params["conv3_b"].reshape(1, -1).astype(jnp.float32)
    aw1 = jnp.asarray(_col_pool_matrix(28, 6), wdt)            # (168, 84)
    aw2 = jnp.asarray(_col_pool_matrix(10, 16), wdt)           # (160, 80)
    wd = params["dense1_w"].T.astype(wdt)                      # (120, 84)
    bd = params["dense1_b"].reshape(1, -1).astype(jnp.float32)
    wo = jnp.zeros((84, ncls), wdt).at[:, :classes].set(params["out_w"].T.astype(wdt))
    bo = jnp.zeros((1, ncls), jnp.float32).at[0, :classes].set(
        params["out_b"].astype(jnp.float32))

    operands = (x3, t1, b1, aw1, t2, b2, aw2, t3, b3, wd, bd, wo, bo)

    def _resident(arr):   # whole array, VMEM-resident across all grid steps
        nd = arr.ndim
        return pl.BlockSpec(arr.shape, lambda i, _nd=nd: (0,) * _nd)

    in_specs = [pl.BlockSpec((32, tb, 32), lambda i: (0, i, 0))]
    in_specs += [_resident(a) for a in operands[1:]]
    out_specs = pl.BlockSpec((tb, ncls), lambda i: (i, 0))

    # advisory cost estimate
    mm_shapes = [(28 * tb, 160, 168), (14 * tb, 168, 84),
                 (10 * tb, 420, 160), (5 * tb, 160, 80),
                 (tb, 400, 120), (tb, 120, 84), (tb, 84, ncls)]
    flops = 2 * steps * sum(m * k * n for m, k, n in mm_shapes)
    transcendentals = steps * tb * (28 * 168 + 10 * 160 + 120 + 84)
    bytes_accessed = sum(int(np.prod(a.shape)) * a.dtype.itemsize for a in operands)
    bytes_accessed += padded * ncls * 4

    out = pl.pallas_call(
        _lenet5_kernel,
        out_shape=jax.ShapeDtypeStruct((padded, ncls), jnp.float32),
        grid=(steps,),
        in_specs=in_specs,
        out_specs=out_specs,
        compiler_params=pltpu.CompilerParams(
            dimension_semantics=("parallel",),          # megacore sharding on v7x
            vmem_limit_bytes=32 * 1024 * 1024),
        cost_estimate=pl.CostEstimate(flops=int(flops),
                                      transcendentals=int(transcendentals),
                                      bytes_accessed=int(bytes_accessed)),
    )(*operands)
    return out[:batch, :classes]


# ------------------------------ init & reference -----------------------------

def init_params(key, classes=10):
    ks = jax.random.split(key, 10)
    def w(k, shape, fan_in):
        return jax.random.normal(k, shape, jnp.float32) / np.sqrt(fan_in)
    def b(k, n):
        return 0.01 * jax.random.normal(k, (n,), jnp.float32)
    return {
        "conv1_w": w(ks[0], (6, 1, 5, 5), 25),     "conv1_b": b(ks[1], 6),
        "conv2_w": w(ks[2], (16, 6, 5, 5), 150),   "conv2_b": b(ks[3], 16),
        "conv3_w": w(ks[4], (120, 16, 5, 5), 400), "conv3_b": b(ks[5], 120),
        "dense1_w": w(ks[6], (84, 120), 120),      "dense1_b": b(ks[7], 84),
        "out_w": w(ks[8], (classes, 84), 84),      "out_b": b(ks[9], classes),
    }


def lenet5_reference(x, params):
    sig = jax.nn.sigmoid
    def conv(x, w, b):
        y = jax.lax.conv_general_dilated(
            x, w, window_strides=(1, 1), padding="VALID",
            dimension_numbers=("NCHW", "OIHW", "NCHW"))
        return y + b[None, :, None, None]
    def pool(x):
        n, c, h, w = x.shape
        return x.reshape(n, c, h // 2, 2, w // 2, 2).mean(axis=(3, 5))
    y = pool(sig(conv(x, params["conv1_w"], params["conv1_b"])))
    y = pool(sig(conv(y, params["conv2_w"], params["conv2_b"])))
    y = sig(conv(y, params["conv3_w"], params["conv3_b"])).reshape(x.shape[0], -1)
    y = sig(y @ params["dense1_w"].T + params["dense1_b"])
    return y @ params["out_w"].T + params["out_b"]


if __name__ == "__main__":
    key = jax.random.PRNGKey(0)
    k_x, k_p = jax.random.split(key)
    # LeNet5 needs 32x32 single-channel input for the 5x5 conv stack to reach 1x1.
    x = jax.random.normal(k_x, (2, 1, 32, 32), jnp.float32)
    params = init_params(k_p, classes=10)

    logits = lenet5_forward(x, params)
    jax.block_until_ready(logits)

    assert logits.shape == (2, 10) and logits.dtype == jnp.float32
    assert bool(jnp.all(jnp.isfinite(logits)))
    ref = lenet5_reference(x, params)
    err = float(jnp.max(jnp.abs(logits - ref)))
    assert err < 1e-1, f"max abs error vs reference too large: {err}"
    print("KERNEL_OK")
</pallas_src>

<mosaic_0001>
module attributes {stable_mosaic.version = 11 : i64} {
  func.func @_lenet5_kernel(%arg0: i32, %arg1: memref<32x2x32xbf16, #tpu.memory_space<vmem>>, %arg2: memref<160x168xbf16, #tpu.memory_space<vmem>>, %arg3: memref<1x168xf32, #tpu.memory_space<vmem>>, %arg4: memref<168x84xbf16, #tpu.memory_space<vmem>>, %arg5: memref<420x160xbf16, #tpu.memory_space<vmem>>, %arg6: memref<1x160xf32, #tpu.memory_space<vmem>>, %arg7: memref<160x80xbf16, #tpu.memory_space<vmem>>, %arg8: memref<400x120xbf16, #tpu.memory_space<vmem>>, %arg9: memref<1x120xf32, #tpu.memory_space<vmem>>, %arg10: memref<120x84xbf16, #tpu.memory_space<vmem>>, %arg11: memref<1x84xf32, #tpu.memory_space<vmem>>, %arg12: memref<84x128xbf16, #tpu.memory_space<vmem>>, %arg13: memref<1x128xf32, #tpu.memory_space<vmem>>, %arg14: memref<2x128xf32, #tpu.memory_space<vmem>>) attributes {dimension_semantics = [#tpu.dimension_semantics<parallel>], iteration_bounds = array<i64: 1>, scalar_prefetch = 0 : i64, scratch_operands = 0 : i64, tpu.core_type = #tpu.core_type<tc>, window_params = [{transform_indices = @transform_0, window_bounds = array<i64: 32, 2, 32>}, {pipeline_mode = #tpu.pipeline_mode<synchronous>, transform_indices = @transform_1, window_bounds = array<i64: 160, 168>}, {pipeline_mode = #tpu.pipeline_mode<synchronous>, transform_indices = @transform_2, window_bounds = array<i64: 1, 168>}, {pipeline_mode = #tpu.pipeline_mode<synchronous>, transform_indices = @transform_3, window_bounds = array<i64: 168, 84>}, {pipeline_mode = #tpu.pipeline_mode<synchronous>, transform_indices = @transform_4, window_bounds = array<i64: 420, 160>}, {pipeline_mode = #tpu.pipeline_mode<synchronous>, transform_indices = @transform_5, window_bounds = array<i64: 1, 160>}, {pipeline_mode = #tpu.pipeline_mode<synchronous>, transform_indices = @transform_6, window_bounds = array<i64: 160, 80>}, {pipeline_mode = #tpu.pipeline_mode<synchronous>, transform_indices = @transform_7, window_bounds = array<i64: 400, 120>}, {pipeline_mode = #tpu.pipeline_mode<synchronous>, transform_indices = @transform_8, window_bounds = array<i64: 1, 120>}, {pipeline_mode = #tpu.pipeline_mode<synchronous>, transform_indices = @transform_9, window_bounds = array<i64: 120, 84>}, {pipeline_mode = #tpu.pipeline_mode<synchronous>, transform_indices = @transform_10, window_bounds = array<i64: 1, 84>}, {pipeline_mode = #tpu.pipeline_mode<synchronous>, transform_indices = @transform_11, window_bounds = array<i64: 84, 128>}, {pipeline_mode = #tpu.pipeline_mode<synchronous>, transform_indices = @transform_12, window_bounds = array<i64: 1, 128>}, {transform_indices = @transform_13, window_bounds = array<i64: 2, 128>}]} {
    %c0 = arith.constant 0 : index
    %c0_0 = arith.constant 0 : index
    %c0_1 = arith.constant 0 : index
    %0 = vector.load %arg1[%c0, %c0_0, %c0_1] : memref<32x2x32xbf16, #tpu.memory_space<vmem>>, vector<32x2x32xbf16>
    %1 = vector.extract_strided_slice %0 {offsets = [0, 0, 0], sizes = [28, 2, 32], strides = [1, 1, 1]} : vector<32x2x32xbf16> to vector<28x2x32xbf16>
    %2 = vector.shape_cast %1 : vector<28x2x32xbf16> to vector<56x32xbf16>
    %3 = vector.extract_strided_slice %0 {offsets = [1, 0, 0], sizes = [28, 2, 32], strides = [1, 1, 1]} : vector<32x2x32xbf16> to vector<28x2x32xbf16>
    %4 = vector.shape_cast %3 : vector<28x2x32xbf16> to vector<56x32xbf16>
    %5 = vector.extract_strided_slice %0 {offsets = [2, 0, 0], sizes = [28, 2, 32], strides = [1, 1, 1]} : vector<32x2x32xbf16> to vector<28x2x32xbf16>
    %6 = vector.shape_cast %5 : vector<28x2x32xbf16> to vector<56x32xbf16>
    %7 = vector.extract_strided_slice %0 {offsets = [3, 0, 0], sizes = [28, 2, 32], strides = [1, 1, 1]} : vector<32x2x32xbf16> to vector<28x2x32xbf16>
    %8 = vector.shape_cast %7 : vector<28x2x32xbf16> to vector<56x32xbf16>
    %9 = vector.extract_strided_slice %0 {offsets = [4, 0, 0], sizes = [28, 2, 32], strides = [1, 1, 1]} : vector<32x2x32xbf16> to vector<28x2x32xbf16>
    %10 = vector.shape_cast %9 : vector<28x2x32xbf16> to vector<56x32xbf16>
    %11 = tpu.concatenate %2, %4, %6, %8, %10 in 1 : vector<56x32xbf16>, vector<56x32xbf16>, vector<56x32xbf16>, vector<56x32xbf16>, vector<56x32xbf16> -> vector<56x160xbf16>
    %c0_2 = arith.constant 0 : index
    %c0_3 = arith.constant 0 : index
    %12 = vector.load %arg2[%c0_2, %c0_3] : memref<160x168xbf16, #tpu.memory_space<vmem>>, vector<160x168xbf16>
    %cst = arith.constant dense<0.000000e+00> : vector<56x168xf32>
    %13 = tpu.matmul %11, %12, %cst {dimension_numbers = #tpu.dot_dimension_numbers<[1], [0], [0], [1], [0, 0, 1, 1], [], []>} : vector<56x160xbf16>, vector<160x168xbf16>, vector<56x168xf32> -> vector<56x168xf32>
    %c0_4 = arith.constant 0 : index
    %c0_5 = arith.constant 0 : index
    %14 = vector.load %arg3[%c0_4, %c0_5] : memref<1x168xf32, #tpu.memory_space<vmem>>, vector<1x168xf32>
    %15 = vector.broadcast %14 : vector<1x168xf32> to vector<56x168xf32>
    %16 = arith.addf %13, %15 : vector<56x168xf32>
    %cst_6 = arith.constant 5.000000e-01 : f32
    %17 = vector.broadcast %cst_6 : f32 to vector<56x168xf32>
    %18 = arith.mulf %17, %16 : vector<56x168xf32>
    %19 = math.tanh %18 : vector<56x168xf32>
    %cst_7 = arith.constant 5.000000e-01 : f32
    %20 = vector.broadcast %cst_7 : f32 to vector<56x168xf32>
    %21 = arith.mulf %20, %19 : vector<56x168xf32>
    %cst_8 = arith.constant 5.000000e-01 : f32
    %22 = vector.broadcast %cst_8 : f32 to vector<56x168xf32>
    %23 = arith.addf %22, %21 : vector<56x168xf32>
    %24 = vector.shape_cast %23 : vector<56x168xf32> to vector<14x2x2x168xf32>
    %25 = vector.extract_strided_slice %24 {offsets = [0, 0, 0, 0], sizes = [14, 1, 2, 168], strides = [1, 1, 1, 1]} : vector<14x2x2x168xf32> to vector<14x1x2x168xf32>
    %26 = vector.shape_cast %25 : vector<14x1x2x168xf32> to vector<14x2x168xf32>
    %27 = vector.extract_strided_slice %24 {offsets = [0, 1, 0, 0], sizes = [14, 1, 2, 168], strides = [1, 1, 1, 1]} : vector<14x2x2x168xf32> to vector<14x1x2x168xf32>
    %28 = vector.shape_cast %27 : vector<14x1x2x168xf32> to vector<14x2x168xf32>
    %29 = arith.addf %26, %28 : vector<14x2x168xf32>
    %30 = arith.truncf %29 : vector<14x2x168xf32> to vector<14x2x168xbf16>
    %31 = vector.shape_cast %30 : vector<14x2x168xbf16> to vector<28x168xbf16>
    %c0_9 = arith.constant 0 : index
    %c0_10 = arith.constant 0 : index
    %32 = vector.load %arg4[%c0_9, %c0_10] : memref<168x84xbf16, #tpu.memory_space<vmem>>, vector<168x84xbf16>
    %cst_11 = arith.constant dense<0.000000e+00> : vector<28x84xf32>
    %33 = tpu.matmul %31, %32, %cst_11 {dimension_numbers = #tpu.dot_dimension_numbers<[1], [0], [0], [1], [0, 0, 1, 1], [], []>} : vector<28x168xbf16>, vector<168x84xbf16>, vector<28x84xf32> -> vector<28x84xf32>
    %34 = arith.truncf %33 : vector<28x84xf32> to vector<28x84xbf16>
    %35 = vector.shape_cast %34 : vector<28x84xbf16> to vector<14x2x84xbf16>
    %36 = vector.extract_strided_slice %35 {offsets = [0, 0, 0], sizes = [10, 2, 84], strides = [1, 1, 1]} : vector<14x2x84xbf16> to vector<10x2x84xbf16>
    %37 = vector.shape_cast %36 : vector<10x2x84xbf16> to vector<20x84xbf16>
    %38 = vector.extract_strided_slice %35 {offsets = [1, 0, 0], sizes = [10, 2, 84], strides = [1, 1, 1]} : vector<14x2x84xbf16> to vector<10x2x84xbf16>
    %39 = vector.shape_cast %38 : vector<10x2x84xbf16> to vector<20x84xbf16>
    %40 = vector.extract_strided_slice %35 {offsets = [2, 0, 0], sizes = [10, 2, 84], strides = [1, 1, 1]} : vector<14x2x84xbf16> to vector<10x2x84xbf16>
    %41 = vector.shape_cast %40 : vector<10x2x84xbf16> to vector<20x84xbf16>
    %42 = vector.extract_strided_slice %35 {offsets = [3, 0, 0], sizes = [10, 2, 84], strides = [1, 1, 1]} : vector<14x2x84xbf16> to vector<10x2x84xbf16>
    %43 = vector.shape_cast %42 : vector<10x2x84xbf16> to vector<20x84xbf16>
    %44 = vector.extract_strided_slice %35 {offsets = [4, 0, 0], sizes = [10, 2, 84], strides = [1, 1, 1]} : vector<14x2x84xbf16> to vector<10x2x84xbf16>
    %45 = vector.shape_cast %44 : vector<10x2x84xbf16> to vector<20x84xbf16>
    %46 = tpu.concatenate %37, %39, %41, %43, %45 in 1 : vector<20x84xbf16>, vector<20x84xbf16>, vector<20x84xbf16>, vector<20x84xbf16>, vector<20x84xbf16> -> vector<20x420xbf16>
    %c0_12 = arith.constant 0 : index
    %c0_13 = arith.constant 0 : index
    %47 = vector.load %arg5[%c0_12, %c0_13] : memref<420x160xbf16, #tpu.memory_space<vmem>>, vector<420x160xbf16>
    %cst_14 = arith.constant dense<0.000000e+00> : vector<20x160xf32>
    %48 = tpu.matmul %46, %47, %cst_14 {dimension_numbers = #tpu.dot_dimension_numbers<[1], [0], [0], [1], [0, 0, 1, 1], [], []>} : vector<20x420xbf16>, vector<420x160xbf16>, vector<20x160xf32> -> vector<20x160xf32>
    %c0_15 = arith.constant 0 : index
    %c0_16 = arith.constant 0 : index
    %49 = vector.load %arg6[%c0_15, %c0_16] : memref<1x160xf32, #tpu.memory_space<vmem>>, vector<1x160xf32>
    %50 = vector.broadcast %49 : vector<1x160xf32> to vector<20x160xf32>
    %51 = arith.addf %48, %50 : vector<20x160xf32>
    %cst_17 = arith.constant 5.000000e-01 : f32
    %52 = vector.broadcast %cst_17 : f32 to vector<20x160xf32>
    %53 = arith.mulf %52, %51 : vector<20x160xf32>
    %54 = math.tanh %53 : vector<20x160xf32>
    %cst_18 = arith.constant 5.000000e-01 : f32
    %55 = vector.broadcast %cst_18 : f32 to vector<20x160xf32>
    %56 = arith.mulf %55, %54 : vector<20x160xf32>
    %cst_19 = arith.constant 5.000000e-01 : f32
    %57 = vector.broadcast %cst_19 : f32 to vector<20x160xf32>
    %58 = arith.addf %57, %56 : vector<20x160xf32>
    %59 = vector.shape_cast %58 : vector<20x160xf32> to vector<5x2x2x160xf32>
    %60 = vector.extract_strided_slice %59 {offsets = [0, 0, 0, 0], sizes = [5, 1, 2, 160], strides = [1, 1, 1, 1]} : vector<5x2x2x160xf32> to vector<5x1x2x160xf32>
    %61 = vector.shape_cast %60 : vector<5x1x2x160xf32> to vector<5x2x160xf32>
    %62 = vector.extract_strided_slice %59 {offsets = [0, 1, 0, 0], sizes = [5, 1, 2, 160], strides = [1, 1, 1, 1]} : vector<5x2x2x160xf32> to vector<5x1x2x160xf32>
    %63 = vector.shape_cast %62 : vector<5x1x2x160xf32> to vector<5x2x160xf32>
    %64 = arith.addf %61, %63 : vector<5x2x160xf32>
    %65 = arith.truncf %64 : vector<5x2x160xf32> to vector<5x2x160xbf16>
    %66 = vector.shape_cast %65 : vector<5x2x160xbf16> to vector<10x160xbf16>
    %c0_20 = arith.constant 0 : index
    %c0_21 = arith.constant 0 : index
    %67 = vector.load %arg7[%c0_20, %c0_21] : memref<160x80xbf16, #tpu.memory_space<vmem>>, vector<160x80xbf16>
    %cst_22 = arith.constant dense<0.000000e+00> : vector<10x80xf32>
    %68 = tpu.matmul %66, %67, %cst_22 {dimension_numbers = #tpu.dot_dimension_numbers<[1], [0], [0], [1], [0, 0, 1, 1], [], []>} : vector<10x160xbf16>, vector<160x80xbf16>, vector<10x80xf32> -> vector<10x80xf32>
    %69 = arith.truncf %68 : vector<10x80xf32> to vector<10x80xbf16>
    %70 = vector.shape_cast %69 : vector<10x80xbf16> to vector<5x2x80xbf16>
    %71 = vector.extract_strided_slice %70 {offsets = [0, 0, 0], sizes = [1, 2, 80], strides = [1, 1, 1]} : vector<5x2x80xbf16> to vector<1x2x80xbf16>
    %72 = vector.shape_cast %71 : vector<1x2x80xbf16> to vector<2x80xbf16>
    %73 = vector.extract_strided_slice %70 {offsets = [1, 0, 0], sizes = [1, 2, 80], strides = [1, 1, 1]} : vector<5x2x80xbf16> to vector<1x2x80xbf16>
    %74 = vector.shape_cast %73 : vector<1x2x80xbf16> to vector<2x80xbf16>
    %75 = vector.extract_strided_slice %70 {offsets = [2, 0, 0], sizes = [1, 2, 80], strides = [1, 1, 1]} : vector<5x2x80xbf16> to vector<1x2x80xbf16>
    %76 = vector.shape_cast %75 : vector<1x2x80xbf16> to vector<2x80xbf16>
    %77 = vector.extract_strided_slice %70 {offsets = [3, 0, 0], sizes = [1, 2, 80], strides = [1, 1, 1]} : vector<5x2x80xbf16> to vector<1x2x80xbf16>
    %78 = vector.shape_cast %77 : vector<1x2x80xbf16> to vector<2x80xbf16>
    %79 = vector.extract_strided_slice %70 {offsets = [4, 0, 0], sizes = [1, 2, 80], strides = [1, 1, 1]} : vector<5x2x80xbf16> to vector<1x2x80xbf16>
    %80 = vector.shape_cast %79 : vector<1x2x80xbf16> to vector<2x80xbf16>
    %81 = tpu.concatenate %72, %74, %76, %78, %80 in 1 : vector<2x80xbf16>, vector<2x80xbf16>, vector<2x80xbf16>, vector<2x80xbf16>, vector<2x80xbf16> -> vector<2x400xbf16>
    %c0_23 = arith.constant 0 : index
    %c0_24 = arith.constant 0 : index
    %82 = vector.load %arg8[%c0_23, %c0_24] : memref<400x120xbf16, #tpu.memory_space<vmem>>, vector<400x120xbf16>
    %cst_25 = arith.constant dense<0.000000e+00> : vector<2x120xf32>
    %83 = tpu.matmul %81, %82, %cst_25 {dimension_numbers = #tpu.dot_dimension_numbers<[1], [0], [0], [1], [0, 0, 1, 1], [], []>} : vector<2x400xbf16>, vector<400x120xbf16>, vector<2x120xf32> -> vector<2x120xf32>
    %c0_26 = arith.constant 0 : index
    %c0_27 = arith.constant 0 : index
    %84 = vector.load %arg9[%c0_26, %c0_27] : memref<1x120xf32, #tpu.memory_space<vmem>>, vector<1x120xf32>
    %85 = vector.broadcast %84 : vector<1x120xf32> to vector<2x120xf32>
    %86 = arith.addf %83, %85 : vector<2x120xf32>
    %cst_28 = arith.constant 5.000000e-01 : f32
    %87 = vector.broadcast %cst_28 : f32 to vector<2x120xf32>
    %88 = arith.mulf %87, %86 : vector<2x120xf32>
    %89 = math.tanh %88 : vector<2x120xf32>
    %cst_29 = arith.constant 5.000000e-01 : f32
    %90 = vector.broadcast %cst_29 : f32 to vector<2x120xf32>
    %91 = arith.mulf %90, %89 : vector<2x120xf32>
    %cst_30 = arith.constant 5.000000e-01 : f32
    %92 = vector.broadcast %cst_30 : f32 to vector<2x120xf32>
    %93 = arith.addf %92, %91 : vector<2x120xf32>
    %94 = arith.truncf %93 : vector<2x120xf32> to vector<2x120xbf16>
    %c0_31 = arith.constant 0 : index
    %c0_32 = arith.constant 0 : index
    %95 = vector.load %arg10[%c0_31, %c0_32] : memref<120x84xbf16, #tpu.memory_space<vmem>>, vector<120x84xbf16>
    %cst_33 = arith.constant dense<0.000000e+00> : vector<2x84xf32>
    %96 = tpu.matmul %94, %95, %cst_33 {dimension_numbers = #tpu.dot_dimension_numbers<[1], [0], [0], [1], [0, 0, 1, 1], [], []>} : vector<2x120xbf16>, vector<120x84xbf16>, vector<2x84xf32> -> vector<2x84xf32>
    %c0_34 = arith.constant 0 : index
    %c0_35 = arith.constant 0 : index
    %97 = vector.load %arg11[%c0_34, %c0_35] : memref<1x84xf32, #tpu.memory_space<vmem>>, vector<1x84xf32>
    %98 = vector.broadcast %97 : vector<1x84xf32> to vector<2x84xf32>
    %99 = arith.addf %96, %98 : vector<2x84xf32>
    %cst_36 = arith.constant 5.000000e-01 : f32
    %100 = vector.broadcast %cst_36 : f32 to vector<2x84xf32>
    %101 = arith.mulf %100, %99 : vector<2x84xf32>
    %102 = math.tanh %101 : vector<2x84xf32>
    %cst_37 = arith.constant 5.000000e-01 : f32
    %103 = vector.broadcast %cst_37 : f32 to vector<2x84xf32>
    %104 = arith.mulf %103, %102 : vector<2x84xf32>
    %cst_38 = arith.constant 5.000000e-01 : f32
    %105 = vector.broadcast %cst_38 : f32 to vector<2x84xf32>
    %106 = arith.addf %105, %104 : vector<2x84xf32>
    %107 = arith.truncf %106 : vector<2x84xf32> to vector<2x84xbf16>
    %c0_39 = arith.constant 0 : index
    %c0_40 = arith.constant 0 : index
    %108 = vector.load %arg12[%c0_39, %c0_40] : memref<84x128xbf16, #tpu.memory_space<vmem>>, vector<84x128xbf16>
    %cst_41 = arith.constant dense<0.000000e+00> : vector<2x128xf32>
    %109 = tpu.matmul %107, %108, %cst_41 {dimension_numbers = #tpu.dot_dimension_numbers<[1], [0], [0], [1], [0, 0, 1, 1], [], []>} : vector<2x84xbf16>, vector<84x128xbf16>, vector<2x128xf32> -> vector<2x128xf32>
    %c0_42 = arith.constant 0 : index
    %c0_43 = arith.constant 0 : index
    %110 = vector.load %arg13[%c0_42, %c0_43] : memref<1x128xf32, #tpu.memory_space<vmem>>, vector<1x128xf32>
    %111 = vector.broadcast %110 : vector<1x128xf32> to vector<2x128xf32>
    %112 = arith.addf %109, %111 : vector<2x128xf32>
    %c0_44 = arith.constant 0 : index
    %c0_45 = arith.constant 0 : index
    %113 = vector.load %arg14[%c0_44, %c0_45] : memref<2x128xf32, #tpu.memory_space<vmem>>, vector<2x128xf32>
    tpu.vector_store %arg14[%c0_44, %c0_45], %112 {strides = array<i32>} : memref<2x128xf32, #tpu.memory_space<vmem>>, vector<2x128xf32>,
    return
  }
  func.func @transform_0(%arg0: i32) -> (i32, i32, i32) {
    %c0_i32 = arith.constant 0 : i32
    %c0_i32_0 = arith.constant 0 : i32
    %c0_i32_1 = arith.constant 0 : i32
    return %c0_i32, %arg0, %c0_i32_0 : i32, i32, i32
  }
  func.func @transform_1(%arg0: i32) -> (i32, i32) {
    %c0_i32 = arith.constant 0 : i32
    %c0_i32_0 = arith.constant 0 : i32
    %c0_i32_1 = arith.constant 0 : i32
    return %c0_i32, %c0_i32_0 : i32, i32
  }
  func.func @transform_2(%arg0: i32) -> (i32, i32) {
    %c0_i32 = arith.constant 0 : i32
    %c0_i32_0 = arith.constant 0 : i32
    %c0_i32_1 = arith.constant 0 : i32
    return %c0_i32, %c0_i32_0 : i32, i32
  }
  func.func @transform_3(%arg0: i32) -> (i32, i32) {
    %c0_i32 = arith.constant 0 : i32
    %c0_i32_0 = arith.constant 0 : i32
    %c0_i32_1 = arith.constant 0 : i32
    return %c0_i32, %c0_i32_0 : i32, i32
  }
  func.func @transform_4(%arg0: i32) -> (i32, i32) {
    %c0_i32 = arith.constant 0 : i32
    %c0_i32_0 = arith.constant 0 : i32
    %c0_i32_1 = arith.constant 0 : i32
    return %c0_i32, %c0_i32_0 : i32, i32
  }
  func.func @transform_5(%arg0: i32) -> (i32, i32) {
    %c0_i32 = arith.constant 0 : i32
    %c0_i32_0 = arith.constant 0 : i32
    %c0_i32_1 = arith.constant 0 : i32
    return %c0_i32, %c0_i32_0 : i32, i32
  }
  func.func @transform_6(%arg0: i32) -> (i32, i32) {
    %c0_i32 = arith.constant 0 : i32
    %c0_i32_0 = arith.constant 0 : i32
    %c0_i32_1 = arith.constant 0 : i32
    return %c0_i32, %c0_i32_0 : i32, i32
  }
  func.func @transform_7(%arg0: i32) -> (i32, i32) {
    %c0_i32 = arith.constant 0 : i32
    %c0_i32_0 = arith.constant 0 : i32
    %c0_i32_1 = arith.constant 0 : i32
    return %c0_i32, %c0_i32_0 : i32, i32
  }
  func.func @transform_8(%arg0: i32) -> (i32, i32) {
    %c0_i32 = arith.constant 0 : i32
    %c0_i32_0 = arith.constant 0 : i32
    %c0_i32_1 = arith.constant 0 : i32
    return %c0_i32, %c0_i32_0 : i32, i32
  }
  func.func @transform_9(%arg0: i32) -> (i32, i32) {
    %c0_i32 = arith.constant 0 : i32
    %c0_i32_0 = arith.constant 0 : i32
    %c0_i32_1 = arith.constant 0 : i32
    return %c0_i32, %c0_i32_0 : i32, i32
  }
  func.func @transform_10(%arg0: i32) -> (i32, i32) {
    %c0_i32 = arith.constant 0 : i32
    %c0_i32_0 = arith.constant 0 : i32
    %c0_i32_1 = arith.constant 0 : i32
    return %c0_i32, %c0_i32_0 : i32, i32
  }
  func.func @transform_11(%arg0: i32) -> (i32, i32) {
    %c0_i32 = arith.constant 0 : i32
    %c0_i32_0 = arith.constant 0 : i32
    %c0_i32_1 = arith.constant 0 : i32
    return %c0_i32, %c0_i32_0 : i32, i32
  }
  func.func @transform_12(%arg0: i32) -> (i32, i32) {
    %c0_i32 = arith.constant 0 : i32
    %c0_i32_0 = arith.constant 0 : i32
    %c0_i32_1 = arith.constant 0 : i32
    return %c0_i32, %c0_i32_0 : i32, i32
  }
  func.func @transform_13(%arg0: i32) -> (i32, i32) {
    %c0_i32 = arith.constant 0 : i32
    %c0_i32_0 = arith.constant 0 : i32
    return %arg0, %c0_i32 : i32, i32
  }
}

</mosaic_0001>

<bundles_post_ra>
// kernel: tile.13
= control target key start
LH: loop header
LB: loop body
LE: loop exit
PB: predicated region body
PF: predicated region fallthrough
CT: control target
= control target key end

     0   :  { %s40_s0 = inlined_call_operand.vmem [shape: f32[6], index: 0, kind: input, shape index: {}]   ;;  %s41_s1 = inlined_call_operand.vmem [shape: f32[28,6], index: 1, kind: output, shape index: {}]  }
   0x1   :  { %v4_v0 = vld [vmem:[%s40_s0] ss:$0 sm:$0xff] }
   0x2   :  { %5 = vst [vmem:[%s41_s1] sm:$0xff] %v4_v0  ;;  %12 = vst [vmem:[%s41_s1 + $0x8] sm:$0xff] %v4_v0 }
   0x3   :  { %13 = vst [vmem:[%s41_s1 + $0x10] sm:$0xff] %v4_v0  ;;  %14 = vst [vmem:[%s41_s1 + $0x18] sm:$0xff] %v4_v0 }

// kernel: tile.14
= control target key start
LH: loop header
LB: loop body
LE: loop exit
PB: predicated region body
PF: predicated region fallthrough
CT: control target
= control target key end

     0   :  { %vm9_vm0 = vcmask 15360   ;;  %s250_s12 = smov 126   ;;  %s251_s13 = smov 114   ;;  %vm3_vm1 = vcmask 48128   ;;  %vm13_vm2 = vcmask 31744   ;;  %vm16_vm3 = vcmask 1048560   ;;  %s380_s0 = inlined_call_operand.vmem [shape: f32[28,6], index: 0, kind: input, shape index: {}]   ;;  %s381_s1 = inlined_call_operand.vmem [shape: f32[1,168], index: 1, kind: output, shape index: {}]  }
   0x1   :  { %v194_v0 = vld [vmem:[%s380_s0 + $0x15] sm:$0x1]   ;;  %v197_v3 = vld [vmem:[%s380_s0 + $0x13] sm:$0x1]   ;;  %v196_v4 = vld [vmem:[%s380_s0 + $0x14] sm:$0x1]  }
   0x2   :  { %v195_v1 = vld [vmem:[%s380_s0 + $0x15] sm:$0x1]   ;;  %26 = vrot.lane.b32.xlu1 %v197_v3, %s251_s13  ;;  %v198_v5 = vld [vmem:[%s380_s0 + $0x12] sm:$0x1]   ;;  %s252_s18 = smov 120   ;;  %s253_s19 = smov 108  }
   0x3   :  { %v10_v2 = vsel %vm9_vm0, %v195_v1, %v194_v0  ;;  %v199_v6 = vld [vmem:[%s380_s0 + $0x11] sm:$0x1]   ;;  %v200_v7 = vld [vmem:[%s380_s0 + $0x10] sm:$0x1]   ;;  %s254_s24 = smov 102   ;;  %s255_s25 = smov 96  }
   0x4   :  { %11 = vrot.lane.b32.xlu0 %v10_v2, %s250_s12  ;;  %v201_v8 = vld [vmem:[%s380_s0 + $0xf] sm:$0x1]   ;;  %v202_v9 = vld [vmem:[%s380_s0 + $0xe] sm:$0x1]   ;;  %s256_s30 = smov 90   ;;  %s257_s2 = smov 84  }
   0x5   :  { %v2_v10 = vld [vmem:[%s380_s0] sm:$0x1]   ;;  %v203_v11 = vld [vmem:[%s380_s0 + $0xd] sm:$0x1]   ;;  %v204_v12 = vld [vmem:[%s380_s0 + $0xc] sm:$0x1]  }
   0x6   :  { %32 = vrot.lane.b32.xlu1 %v198_v5, %s253_s19  ;;  %4 = vst.msk [vmem:[#allocation0] sm:$0x1] %vm3_vm1, %v2_v10   ;;  %s258_s9 = smov 78   ;;  %s259_s10 = smov 72   ;;  %v205_v13 = vld [vmem:[%s380_s0 + $0xb] sm:$0x1]  }
   0x7   :  { %v206_v14 = vld [vmem:[%s380_s0 + $0xa] sm:$0x1]   ;;  %s260_s15 = smov 66   ;;  %s261_s16 = smov 60   ;;  %v207_v15 = vld [vmem:[%s380_s0 + $0x9] sm:$0x1]  }
   0x8   :  { %20 = vrot.lane.b32.xlu0 %v196_v4, %s252_s18  ;;  %v208_v16 = vld [vmem:[%s380_s0 + $0x8] sm:$0x1]   ;;  %s262_s21 = smov 54   ;;  %s263_s22 = smov 48   ;;  %v209_v17 = vld [vmem:[%s380_s0 + $0x7] sm:$0x1]  }
   0x9   :  { %v210_v18 = vld [vmem:[%s380_s0 + $0x6] sm:$0x1]   ;;  %s264_s27 = smov 42   ;;  %s265_s28 = smov 36   ;;  %v211_v19 = vld [vmem:[%s380_s0 + $0x1b] sm:$0x1]  }
   0xa   :  { %44 = vrot.lane.b32.xlu1 %v200_v7, %s255_s25  ;;  %v212_v20 = vld [vmem:[%s380_s0 + $0x5] sm:$0x1]   ;;  %s266_s4 = smov 34   ;;  %s267_s5 = smov 30   ;;  %v213_v21 = vld [vmem:[%s380_s0 + $0x1a] sm:$0x1]  }
   0xb   :  { %v214_v22 = vld [vmem:[%s380_s0 + $0x4] sm:$0x1]   ;;  %s269_s11 = smov 24   ;;  %v215_v23 = vld [vmem:[%s380_s0 + $0x19] sm:$0x1]   ;;  %s271_s17 = smov 18  }
   0xc   :  { %38 = vrot.lane.b32.xlu0 %v199_v6, %s254_s24  ;;  %v216_v24 = vld [vmem:[%s380_s0 + $0x3] sm:$0x1]   ;;  %v217_v25 = vld [vmem:[%s380_s0 + $0x18] sm:$0x1]   ;;  %v218_v26 = vld [vmem:[%s380_s0 + $0x2] sm:$0x1]  }
   0xd   :  { %s273_s23 = smov 12   ;;  %v219_v27 = vld [vmem:[%s380_s0 + $0x17] sm:$0x1]   ;;  %v220_v28 = vld [vmem:[%s380_s0 + $0x1] sm:$0x1]   ;;  %s275_s29 = smov 6  }
   0xe   :  { %56 = vrot.lane.b32.xlu1 %v202_v9, %s257_s2  ;;  %v221_v29 = vld [vmem:[%s380_s0 + $0x16] sm:$0x1]   ;;  %s276_s0 = smov 4   ;;  %vm22_vm4 = vcmask 1032128   ;;  %vm28_vm5 = vcmask 982928   ;;  %vm34_vm6 = vcmask 933728  }
   0xf   :  { %vm40_vm7 = vcmask 884528   ;;  %vm46_vm8 = vcmask 835328   ;;  %vm52_vm9 = vcmask 786128   ;;  %vm58_vm10 = vcmask 736928  }
  0x10   :  { %50 = vrot.lane.b32.xlu0 %v201_v8, %s256_s30  ;;  %vm64_vm11 = vcmask 687728   ;;  %vm70_vm12 = vcmask 638528   ;;  %vm76_vm13 = vcmask 589328   ;;  %vm82_vm14 = vcmask 540128  }
  0x11   :  { %vm88_vm15 = vcmask 490928   ;;  %vm94_vm0 = vcmask 441728   ;;  %vm100_vm1 = vcmask 392528  }
  0x12   :  { %68 = vrot.lane.b32.xlu1 %v204_v12, %s259_s10  ;;  %s268_s10 = smov 28  }
  0x14   :  { %62 = vrot.lane.b32.xlu0 %v203_v11, %s258_s9 }
  0x16   :  { %80 = vrot.lane.b32.xlu1 %v206_v14, %s261_s16  ;;  %s270_s16 = smov 22  }
  0x18   :  { %74 = vrot.lane.b32.xlu0 %v205_v13, %s260_s15 }
  0x1a   :  { %92 = vrot.lane.b32.xlu1 %v208_v16, %s263_s22  ;;  %s272_s22 = smov 16  }
  0x1c   :  { %86 = vrot.lane.b32.xlu0 %v207_v15, %s262_s21 }
  0x1e   :  { %104 = vrot.lane.b32.xlu1 %v210_v18, %s265_s28  ;;  %s274_s28 = smov 10  }
  0x20   :  { %98 = vrot.lane.b32.xlu0 %v209_v17, %s264_s27 }
  0x22   :  { %117 = vrot.lane.b32.xlu1 %v212_v20, %s267_s5 }
  0x24   :  { %110 = vrot.lane.b32.xlu0 %v211_v19, %s266_s4 }
  0x26   :  { %130 = vrot.lane.b32.xlu1 %v214_v22, %s269_s11 }
  0x28   :  { %123 = vrot.lane.b32.xlu0 %v213_v21, %s268_s10 }
  0x2a   :  { %143 = vrot.lane.b32.xlu1 %v216_v24, %s271_s17 }
  0x2c   :  { %136 = vrot.lane.b32.xlu0 %v215_v23, %s270_s16 }
  0x2e   :  { %156 = vrot.lane.b32.xlu1 %v218_v26, %s273_s23 }
  0x30   :  { %149 = vrot.lane.b32.xlu0 %v217_v25, %s272_s22 }
  0x32   :  { %169 = vrot.lane.b32.xlu1 %v220_v28, %s275_s29 }
  0x34   :  { %162 = vrot.lane.b32.xlu0 %v219_v27, %s274_s28 }
  0x38   :  { %175 = vrot.lane.b32.xlu0 %v221_v29, %s276_s0 }
  0x74   :  { %v27_v31 = vpop.permute.xlu1 %26  }
  0x76   :  { %v12_v30 = vpop.permute.xlu0 %11  }
  0x77   :  { %15 = vst.msk [vmem:[#allocation0 + $0x8] sm:$0x1] %vm13_vm2, %v12_v30   ;;  %vm106_vm2 = vcmask 343328  }
  0x78   :  { %17 = vst.msk [vmem:[#allocation0] sm:$0x1] %vm16_vm3, %v12_v30   ;;  %v33_v33 = vpop.permute.xlu1 %32   ;;  %vm112_vm3 = vcmask 326928  }
  0x7a   :  { %v21_v32 = vpop.permute.xlu0 %20  }
  0x7b   :  { %23 = vst.msk [vmem:[#allocation0] sm:$0x1] %vm22_vm4, %v21_v32   ;;  %vm119_vm4 = vcmask 294128  }
  0x7c   :  { %29 = vst.msk [vmem:[#allocation0] sm:$0x1] %vm28_vm5, %v27_v31   ;;  %v45_v35 = vpop.permute.xlu1 %44   ;;  %vm125_vm5 = vcmask 277728  }
  0x7d   :  { %35 = vst.msk [vmem:[#allocation0] sm:$0x1] %vm34_vm6, %v33_v33   ;;  %vm132_vm6 = vcmask 244928  }
  0x7e   :  { %v39_v34 = vpop.permute.xlu0 %38  }
  0x7f   :  { %41 = vst.msk [vmem:[#allocation0] sm:$0x1] %vm40_vm7, %v39_v34   ;;  %vm138_vm7 = vcmask 228528  }
  0x80   :  { %47 = vst.msk [vmem:[#allocation0] sm:$0x1] %vm46_vm8, %v45_v35   ;;  %v57_v37 = vpop.permute.xlu1 %56   ;;  %vm145_vm8 = vcmask 195728  }
  0x82   :  { %v51_v36 = vpop.permute.xlu0 %50  }
  0x83   :  { %53 = vst.msk [vmem:[#allocation0] sm:$0x1] %vm52_vm9, %v51_v36   ;;  %vm151_vm9 = vcmask 179328  }
  0x84   :  { %59 = vst.msk [vmem:[#allocation0] sm:$0x1] %vm58_vm10, %v57_v37   ;;  %v69_v39 = vpop.permute.xlu1 %68   ;;  %vm158_vm10 = vcmask 146528  }
  0x86   :  { %v63_v38 = vpop.permute.xlu0 %62  }
  0x87   :  { %65 = vst.msk [vmem:[#allocation0] sm:$0x1] %vm64_vm11, %v63_v38   ;;  %vm164_vm11 = vcmask 130128  }
  0x88   :  { %71 = vst.msk [vmem:[#allocation0] sm:$0x1] %vm70_vm12, %v69_v39   ;;  %v81_v41 = vpop.permute.xlu1 %80   ;;  %vm171_vm12 = vcmask 97328  }
  0x8a   :  { %v75_v40 = vpop.permute.xlu0 %74  }
  0x8b   :  { %77 = vst.msk [vmem:[#allocation0] sm:$0x1] %vm76_vm13, %v75_v40   ;;  %vm177_vm13 = vcmask 80928  }
  0x8c   :  { %83 = vst.msk [vmem:[#allocation0] sm:$0x1] %vm82_vm14, %v81_v41   ;;  %v93_v43 = vpop.permute.xlu1 %92  }
  0x8e   :  { %v87_v42 = vpop.permute.xlu0 %86  }
  0x8f   :  { %89 = vst.msk [vmem:[#allocation0] sm:$0x1] %vm88_vm15, %v87_v42  }
  0x90   :  { %95 = vst.msk [vmem:[#allocation0] sm:$0x1] %vm94_vm0, %v93_v43   ;;  %v105_v45 = vpop.permute.xlu1 %104  }
  0x92   :  { %v99_v44 = vpop.permute.xlu0 %98  }
  0x93   :  { %101 = vst.msk [vmem:[#allocation0] sm:$0x1] %vm100_vm1, %v99_v44  }
  0x94   :  { %107 = vst.msk [vmem:[#allocation0] sm:$0x1] %vm106_vm2, %v105_v45   ;;  %v118_v47 = vpop.permute.xlu1 %117  }
  0x95   :  { %120 = vst.msk [vmem:[#allocation0] sm:$0x1] %vm119_vm4, %v118_v47  }
  0x96   :  { %v111_v46 = vpop.permute.xlu0 %110  }
  0x97   :  { %114 = vst.msk [vmem:[#allocation0 + $0x8] sm:$0x1] %vm112_vm3, %v111_v46  }
  0x98   :  { %v131_v49 = vpop.permute.xlu1 %130  }
  0x99   :  { %133 = vst.msk [vmem:[#allocation0] sm:$0x1] %vm132_vm6, %v131_v49  }
  0x9a   :  { %v124_v48 = vpop.permute.xlu0 %123  }
  0x9b   :  { %127 = vst.msk [vmem:[#allocation0 + $0x8] sm:$0x1] %vm125_vm5, %v124_v48  }
  0x9c   :  { %v144_v51 = vpop.permute.xlu1 %143  }
  0x9d   :  { %146 = vst.msk [vmem:[#allocation0] sm:$0x1] %vm145_vm8, %v144_v51  }
  0x9e   :  { %v137_v50 = vpop.permute.xlu0 %136  }
  0x9f   :  { %140 = vst.msk [vmem:[#allocation0 + $0x8] sm:$0x1] %vm138_vm7, %v137_v50  }
  0xa0   :  { %v157_v53 = vpop.permute.xlu1 %156  }
  0xa1   :  { %159 = vst.msk [vmem:[#allocation0] sm:$0x1] %vm158_vm10, %v157_v53  }
  0xa2   :  { %v150_v52 = vpop.permute.xlu0 %149  }
  0xa3   :  { %153 = vst.msk [vmem:[#allocation0 + $0x8] sm:$0x1] %vm151_vm9, %v150_v52  }
  0xa4   :  { %v170_v55 = vpop.permute.xlu1 %169  }
  0xa5   :  { %172 = vst.msk [vmem:[#allocation0] sm:$0x1] %vm171_vm12, %v170_v55  }
  0xa6   :  { %v163_v54 = vpop.permute.xlu0 %162  }
  0xa7   :  { %166 = vst.msk [vmem:[#allocation0 + $0x8] sm:$0x1] %vm164_vm11, %v163_v54  }
  0xaa   :  { %v176_v56 = vpop.permute.xlu0 %175  }
  0xab   :  { %179 = vst.msk [vmem:[#allocation0 + $0x8] sm:$0x1] %vm177_vm13, %v176_v56  }
  0xac   :  { %v184_v57 = vld [vmem:[#allocation0] sm:$0x1] }
  0xad   :  { %187 = vst [vmem:[%s381_s1] sm:$0x1] %v184_v57 }
  0xb2   :  { %v189_v58 = vld [vmem:[#allocation0 + $0x8] sm:$0x1] }
  0xb3   :  { %222 = vst [vmem:[%s381_s1 + $0x1] sm:$0x1] %v189_v58 }

// kernel: tile.18
= control target key start
LH: loop header
LB: loop body
LE: loop exit
PB: predicated region body
PF: predicated region fallthrough
CT: control target
= control target key end

     0   :  { %s28_s0 = inlined_call_operand.vmem [shape: f32[16], index: 0, kind: input, shape index: {}]   ;;  %s29_s1 = inlined_call_operand.vmem [shape: f32[10,16], index: 1, kind: output, shape index: {}]  }
   0x1   :  { %v4_v0 = vld [vmem:[%s28_s0] ss:$0 sm:$0xff] }
   0x2   :  { %5 = vst [vmem:[%s29_s1] sm:$0xff] %v4_v0  ;;  %8 = vst [vmem:[%s29_s1 + $0x8] sm:$0xff] %v4_v0 }

// kernel: tile.19
= control target key start
LH: loop header
LB: loop body
LE: loop exit
PB: predicated region body
PF: predicated region fallthrough
CT: control target
= control target key end

     0   :  { %s78_s10 = smov 112   ;;  %s79_s11 = smov 80   ;;  %vm4_vm0 = vcmask 130048   ;;  %vm10_vm1 = vcmask 1048448   ;;  %vm16_vm2 = vcmask 917248   ;;  %vm22_vm3 = vcmask 786048   ;;  %s125_s0 = inlined_call_operand.vmem [shape: f32[10,16], index: 0, kind: input, shape index: {}]   ;;  %s126_s1 = inlined_call_operand.vmem [shape: f32[1,160], index: 1, kind: output, shape index: {}]  }
   0x1   :  { %v63_v0 = vld [vmem:[%s125_s0 + $0x7] sm:$0x1]   ;;  %v65_v1 = vld [vmem:[%s125_s0 + $0x5] sm:$0x1]   ;;  %v64_v2 = vld [vmem:[%s125_s0 + $0x6] sm:$0x1]  }
   0x2   :  { %8 = vrot.lane.b32.xlu0 %v63_v0, %s78_s10  ;;  %20 = vrot.lane.b32.xlu1 %v65_v1, %s79_s11  ;;  %v66_v3 = vld [vmem:[%s125_s0 + $0x4] sm:$0x1]   ;;  %s2_s16 = smov 3  ;;  %s80_s17 = smov 96   ;;  %v67_v5 = vld [vmem:[%s125_s0 + $0x3] sm:$0x1]  }
   0x3   :  { %s81_s18 = smov 64   ;;  %v3_v4 = vld [vmem:[%s125_s0] ss:$8 sm:%s2_s16]   ;;  %v68_v6 = vld [vmem:[%s125_s0 + $0x2] sm:$0x1]   ;;  %s43_s25 = smov 3 }
   0x4   :  { %5 = vst.msk [vmem:[#allocation0] ss:$8 sm:$0x3] %vm4_vm0, %v3_v4   ;;  %s82_s26 = smov 48   ;;  %s83_s27 = smov 32   ;;  %vm28_vm4 = vcmask 654848  }
   0x5   :  { %v69_v7 = vld [vmem:[%s125_s0 + $0x1] ss:$8 sm:%s43_s25]   ;;  %s84_s0 = smov 16   ;;  %vm34_vm5 = vcmask 523648   ;;  %vm40_vm6 = vcmask 392448   ;;  %vm47_vm7 = vcmask 261248  }
   0x6   :  { %14 = vrot.lane.b32.xlu0 %v64_v2, %s80_s17  ;;  %26 = vrot.lane.b32.xlu1 %v66_v3, %s81_s18 }
   0xa   :  { %32 = vrot.lane.b32.xlu0 %v67_v5, %s82_s26  ;;  %38 = vrot.lane.b32.xlu1 %v68_v6, %s83_s27 }
   0xe   :  { %45 = vrot.lane.b32.xlu0 %v69_v7, %s84_s0 }
  0x74   :  { %v9_v8 = vpop.permute.xlu0 %8   ;;  %v21_v9 = vpop.permute.xlu1 %20  }
  0x75   :  { %11 = vst.msk [vmem:[#allocation0] sm:$0x1] %vm10_vm1, %v9_v8  }
  0x78   :  { %v15_v10 = vpop.permute.xlu0 %14   ;;  %v27_v11 = vpop.permute.xlu1 %26  }
  0x79   :  { %17 = vst.msk [vmem:[#allocation0] sm:$0x1] %vm16_vm2, %v15_v10  }
  0x7a   :  { %23 = vst.msk [vmem:[#allocation0] sm:$0x1] %vm22_vm3, %v21_v9  }
  0x7b   :  { %29 = vst.msk [vmem:[#allocation0] sm:$0x1] %vm28_vm4, %v27_v11  }
  0x7c   :  { %v33_v12 = vpop.permute.xlu0 %32   ;;  %v39_v13 = vpop.permute.xlu1 %38  }
  0x7d   :  { %35 = vst.msk [vmem:[#allocation0] sm:$0x1] %vm34_vm5, %v33_v12  }
  0x7e   :  { %41 = vst.msk [vmem:[#allocation0] sm:$0x1] %vm40_vm6, %v39_v13  }
  0x80   :  { %v46_v14 = vpop.permute.xlu0 %45  }
  0x81   :  { %48 = vst.msk [vmem:[#allocation0] ss:$8 sm:$0x3] %vm47_vm7, %v46_v14  }
  0x88   :  { %v53_v15 = vld [vmem:[#allocation0] sm:$0x1]  ;;  %v58_v16 = vld [vmem:[#allocation0 + $0x8] sm:$0x1] }
  0x89   :  { %56 = vst [vmem:[%s126_s1] sm:$0x1] %v53_v15  ;;  %70 = vst [vmem:[%s126_s1 + $0x1] sm:$0x1] %v58_v16 }

// kernel: lenet5_forward.1
= control target key start
LH: loop header
LB: loop body
LE: loop exit
PB: predicated region body
PF: predicated region fallthrough
CT: control target
= control target key end

     0   :  { %v113_v3 = vlaneseq  ;;  %v4173_v10 = vmov 1966171168   ;;  %s4174_s17 = smov 32   ;;  %s4175_s18 = smov 96   ;;  %vm629_vm0 = vcmask 261120   ;;  %s5241_s0 = inlined_call_operand.vmem [shape: bf16[32,2,32], index: 0, kind: input, shape index: {}]   ;;  %s5242_s1 = inlined_call_operand.vmem [shape: bf16[160,168], index: 1, kind: input, shape index: {}]   ;;  %s5243_s2 = inlined_call_operand.vmem [shape: f32[1,168], index: 2, kind: input, shape index: {}]   ;;  %s5244_s3 = inlined_call_operand.vmem [shape: bf16[168,84], index: 3, kind: input, shape index: {}]   ;;  %s5245_s4 = inlined_call_operand.vmem [shape: bf16[420,160], index: 4, kind: input, shape index: {}]   ;;  %s5246_s5 = inlined_call_operand.vmem [shape: f32[1,160], index: 5, kind: input, shape index: {}]   ;;  %s5247_s6 = inlined_call_operand.vmem [shape: bf16[160,80], index: 6, kind: input, shape index: {}]   ;;  %s5248_s7 = inlined_call_operand.vmem [shape: bf16[400,120], index: 7, kind: input, shape index: {}]   ;;  %s5249_s8 = inlined_call_operand.vmem [shape: f32[1,120], index: 8, kind: input, shape index: {}]   ;;  %s5250_s9 = inlined_call_operand.vmem [shape: bf16[120,84], index: 9, kind: input, shape index: {}]   ;;  %s5251_s10 = inlined_call_operand.vmem [shape: f32[1,84], index: 10, kind: input, shape index: {}]   ;;  %s5252_s11 = inlined_call_operand.vmem [shape: bf16[84,128], index: 11, kind: input, shape index: {}]   ;;  %s5253_s12 = inlined_call_operand.vmem [shape: f32[1,128], index: 12, kind: input, shape index: {}]   ;;  %s5254_s13 = inlined_call_operand.hbm [shape: f32[2,128], index: 13, kind: output, shape index: {}]  }
   0x1   :  { %v4260_v0 = vld [vmem:[%s5241_s0 + $0x1] sm:$0x1]  ;;  %v48_v1 = vld [vmem:[%s5241_s0 + $0x2] sm:$0x1]  ;;  %v49_v2 = vld [vmem:[%s5241_s0 + $0x3] sm:$0x1]  ;;  %v111_v11 = vunpack.c.l.s4 %v4173_v10 }
   0x2   :  { %v50_v4 = vld [vmem:[%s5241_s0 + $0x4] sm:$0x1]  ;;  %v51_v5 = vld [vmem:[%s5241_s0 + $0x5] sm:$0x1]  ;;  %v52_v6 = vld [vmem:[%s5241_s0 + $0x6] sm:$0x1]  ;;  %v107_v9 = vcombine.low %v48_v1, %v49_v2  ;;  %v278_v13 = vcombine.low %v4260_v0, %v48_v1 }
   0x3   :  { %v53_v7 = vld [vmem:[%s5241_s0 + $0x7] sm:$0x1]  ;;  %v54_v8 = vld [vmem:[%s5241_s0 + $0x8] sm:$0x1]  ;;  %v4283_v12 = vshrl.u32 %v113_v3, 7  ;;  %v108_v16 = vcombine.low %v50_v4, %v51_v5  ;;  %v279_v18 = vcombine.low %v49_v2, %v50_v4  ;;  %v280_v19 = vcombine.low %v51_v5, %v52_v6  ;;  %s4176_s27 = smov 64  }
   0x4   :  { %v4289_v14 = vld [vmem:[%s5241_s0] sm:$0x1]  ;;  %v55_v15 = vld [vmem:[%s5241_s0 + $0x9] sm:$0x1]  ;;  %v109_v17 = vcombine.low %v52_v6, %v53_v7  ;;  %v56_v20 = vld [vmem:[%s5241_s0 + $0xa] sm:$0x1]  ;;  %v112_v22 = vunpack.c.0.s8 %v111_v11  ;;  %v281_v23 = vcombine.low %v53_v7, %v54_v8 }
   0x5   :  { %v57_v21 = vld [vmem:[%s5241_s0 + $0xb] sm:$0x1]  ;;  %v106_v24 = vcombine.low %v4289_v14, %v4260_v0  ;;  %v155_v25 = vcombine.low %v54_v8, %v55_v15  ;;  %v58_v26 = vld [vmem:[%s5241_s0 + $0xc] sm:$0x1]  ;;  %v59_v27 = vld [vmem:[%s5241_s0 + $0xd] sm:$0x1]  ;;  %v327_v30 = vcombine.low %v55_v15, %v56_v20 }
   0x6   :  { %v60_v28 = vld [vmem:[%s5241_s0 + $0xe] sm:$0x1]  ;;  %v156_v29 = vcombine.low %v56_v20, %v57_v21  ;;  %v61_v31 = vld [vmem:[%s5241_s0 + $0xf] sm:$0x1]  ;;  %v4317_v32 = vld [vmem:[%s5241_s0 + $0x10] sm:$0x1]  ;;  %v328_v33 = vcombine.low %v57_v21, %v58_v26  ;;  %v4323_v36 = vsub.s32 %v112_v22, %v4283_v12  ;;  %v157_v38 = vcombine.low %v58_v26, %v59_v27 }
   0x7   :  { %v329_v34 = vcombine.low %v59_v27, %v60_v28  ;;  %v63_v35 = vld [vmem:[%s5241_s0 + $0x11] sm:$0x1]  ;;  %v330_v37 = vcombine.low %v61_v31, %v4317_v32  ;;  %v158_v39 = vcombine.low %v60_v28, %v61_v31  ;;  %v4329_v40 = vld [vmem:[%s5241_s0 + $0x12] sm:$0x1]  ;;  %v4334_v41 = vld [vmem:[%s5241_s0 + $0x13] sm:$0x1] }
   0x8   :  { %v4339_v42 = vld [vmem:[%s5241_s0 + $0x14] sm:$0x1]  ;;  %v204_v43 = vcombine.low %v4317_v32, %v63_v35  ;;  %v376_v44 = vcombine.low %v63_v35, %v4329_v40  ;;  %v205_v46 = vcombine.low %v4329_v40, %v4334_v41  ;;  %v288_v47 = vrot.slane %v278_v13, %v4323_v36  ;;  %v3939_v1 = vld [vmem:[%s5242_s1 + $0x70] ss:$8 sps:$4 sm:$0xff]   ;;  %v4382_v6 = vld [vmem:[%s5241_s0 + $0x15] sm:$0x1] }
   0x9   :  { %v377_v45 = vcombine.low %v4334_v41, %v4339_v42  ;;  %v295_v48 = vrot.slane %v279_v18, %v4323_v36  ;;  %v302_v49 = vrot.slane %v280_v19, %v4323_v36  ;;  %v309_v50 = vrot.slane %v281_v23, %v4323_v36  ;;  %v3937_v63 = vld [vmem:[%s5242_s1 + $0x74] ss:$8 sps:$4 sm:$0xff]   ;;  %v3940_v8 = vld [vmem:[%s5242_s1 + $0x64] ss:$8 sps:$4 sm:$0xff]   ;;  %v70_v20 = vld [vmem:[%s5241_s0 + $0x18] sm:$0x1] }
   0xa   :  { %v337_v51 = vrot.slane %v327_v30, %v4323_v36  ;;  %v4353_v52 = vrot.slane %v107_v9, %v4323_v36  ;;  %v4356_v53 = vrot.slane %v108_v16, %v4323_v36  ;;  %v4359_v54 = vrot.slane %v109_v17, %v4323_v36  ;;  %v4387_v7 = vld [vmem:[%s5241_s0 + $0x16] sm:$0x1]  ;;  %v4398_v15 = vld [vmem:[%s5241_s0 + $0x17] sm:$0x1]  ;;  %808 = vmatprep.subr.bf16.mxu0 %v3937_v63  ;;  %v3942_v21 = vld [vmem:[%s5242_s1 + $0x60] ss:$8 sps:$4 sm:$0xff]  }
   0xb   :  { %v310_v55 = vcombine.low %v288_v47, %v295_v48  ;;  %v311_v56 = vcombine.low %v302_v49, %v309_v50  ;;  %v534_v57 = vcombine.low %v295_v48, %v302_v49  ;;  %v4362_v58 = vrot.slane %v155_v25, %v4323_v36  ;;  %809 = vmatpush1.bf16.msra.mxu0 %v3939_v1  ;;  %v3943_v27 = vld [vmem:[%s5242_s1 + $0x54] ss:$8 sps:$4 sm:$0xff]   ;;  %v3945_v47 = vld [vmem:[%s5242_s1 + $0x50] ss:$8 sps:$4 sm:$0xff]   ;;  %v3948_v40 = vld [vmem:[%s5242_s1 + $0x40] ss:$8 sps:$4 sm:$0xff]  }
   0xc   :  { %v535_v59 = vcombine.low %v309_v50, %v337_v51  ;;  %v458_v60 = vcombine.low %v4353_v52, %v4356_v53  ;;  %v344_v61 = vrot.slane %v328_v33, %v4323_v36  ;;  %v351_v62 = vrot.slane %v329_v34, %v4323_v36  ;;  %810 = vmatprep.subr.bf16.mxu0 %v3940_v8 }
   0xd   :  { %v318_v2 = vrot.slane %v310_v55, %v4323_v36  ;;  %v325_v3 = vrot.slane %v311_v56, %v4323_v36  ;;  %v542_v4 = vrot.slane %v534_v57, %v4323_v36  ;;  %v459_v5 = vcombine.low %v4359_v54, %v4362_v58  ;;  %v3946_v55 = vld [vmem:[%s5242_s1 + $0x44] ss:$8 sps:$4 sm:$0xff]  }
   0xe   :  { %v549_v9 = vrot.slane %v535_v59, %v4323_v36  ;;  %v466_v10 = vrot.slane %v458_v60, %v4323_v36  ;;  %v358_v11 = vrot.slane %v330_v37, %v4323_v36  ;;  %v359_v13 = vcombine.low %v337_v51, %v344_v61 }
   0xf   :  { %v326_v16 = vcombine.low %v318_v2, %v325_v3  ;;  %v473_v17 = vrot.slane %v459_v5, %v4323_v36  ;;  %v4402_v18 = vrot.slane %v156_v29, %v4323_v36  ;;  %v4405_v19 = vrot.slane %v157_v38, %v4323_v36  ;;  %811 = vmatpush1.bf16.msra.mxu0 %v3942_v21 }
  0x10   :  { %v550_v22 = vcombine.low %v542_v4, %v549_v9  ;;  %v360_v23 = vcombine.low %v351_v62, %v358_v11  ;;  %v367_v25 = vrot.slane %v359_v13, %v4323_v36  ;;  %v4415_v26 = vrot.slane %v158_v39, %v4323_v36  ;;  %812 = vmatprep.subr.bf16.mxu0 %v3943_v27  ;;  %v77_v27 = vld [vmem:[%s5241_s0 + $0x1f] sm:$0x1] }
  0x11   :  { %449 = vrot.lane.b32.xlu0 %v326_v16, %s4174_s17  ;;  %v474_v28 = vcombine.low %v466_v10, %v473_v17  ;;  %v4422_v29 = vrot.slane %v204_v43, %v4323_v36  ;;  %v475_v30 = vcombine.low %v4402_v18, %v4405_v19  ;;  %v386_v31 = vrot.slane %v376_v44, %v4323_v36  ;;  %v71_v44 = vld [vmem:[%s5241_s0 + $0x19] sm:$0x1]  ;;  %v76_v10 = vld [vmem:[%s5241_s0 + $0x1e] sm:$0x1] }
  0x12   :  { %601 = vrot.lane.b32.xlu1 %v550_v22, %s4175_s18  ;;  %v374_v32 = vrot.slane %v360_v23, %v4323_v36  ;;  %v551_v33 = vcombine.low %v344_v61, %v351_v62  ;;  %v378_v34 = vcombine.low %v4382_v6, %v4387_v7  ;;  %v379_v35 = vcombine.low %v4398_v15, %v70_v20  ;;  %v73_v61 = vld [vmem:[%s5241_s0 + $0x1b] sm:$0x1] }
  0x13   :  { %v476_v37 = vcombine.low %v4415_v26, %v4422_v29  ;;  %v483_v38 = vrot.slane %v475_v30, %v4323_v36  ;;  %v552_v39 = vcombine.low %v358_v11, %v386_v31  ;;  %v393_v43 = vrot.slane %v377_v45, %v4323_v36  ;;  %v72_v45 = vld [vmem:[%s5241_s0 + $0x1a] sm:$0x1]  ;;  %813 = vmatpush1.bf16.msra.mxu0 %v3945_v47  ;;  %v3949_v11 = vld [vmem:[%s5242_s1 + $0x34] ss:$8 sps:$4 sm:$0xff]  }
  0x14   :  { %v375_v48 = vcombine.low %v367_v25, %v374_v32  ;;  %v559_v49 = vrot.slane %v551_v33, %v4323_v36  ;;  %v400_v50 = vrot.slane %v378_v34, %v4323_v36  ;;  %v407_v51 = vrot.slane %v379_v35, %v4323_v36  ;;  %814 = vmatprep.subr.bf16.mxu0 %v3946_v55 }
  0x15   :  { %525 = vrot.lane.b32.xlu0 %v474_v28, %s4176_s27  ;;  %v490_v56 = vrot.slane %v476_v37, %v4323_v36  ;;  %v566_v57 = vrot.slane %v552_v39, %v4323_v36  ;;  %v408_v59 = vcombine.low %v386_v31, %v393_v43  ;;  %v206_v60 = vcombine.low %v4339_v42, %v4382_v6  ;;  %v74_v42 = vld [vmem:[%s5241_s0 + $0x1c] sm:$0x1]  ;;  %v3952_v28 = vld [vmem:[%s5242_s1 + $0x24] ss:$8 sps:$4 sm:$0xff]  }
  0x16   :  { %451 = vrot.lane.b32.xlu1 %v375_v48, %s4174_s17  ;;  %v409_v62 = vcombine.low %v400_v50, %v407_v51  ;;  %v207_v63 = vcombine.low %v4387_v7, %v4398_v15  ;;  %v4466_v1 = vrot.slane %v205_v46, %v4323_v36  ;;  %v253_v2 = vcombine.low %v70_v20, %v71_v44  ;;  %v75_v7 = vld [vmem:[%s5241_s0 + $0x1d] sm:$0x1]  ;;  %v3951_v20 = vld [vmem:[%s5242_s1 + $0x30] ss:$8 sps:$4 sm:$0xff]  }
  0x17   :  { %v491_v3 = vcombine.low %v483_v38, %v490_v56  ;;  %v567_v4 = vcombine.low %v559_v49, %v566_v57  ;;  %v416_v5 = vrot.slane %v408_v59, %v4323_v36  ;;  %v4473_v6 = vrot.slane %v206_v60, %v4323_v36  ;;  %815 = vmatpush1.bf16.msra.mxu0 %v3948_v40  ;;  %v3957_v59 = vld [vmem:[%s5242_s1 + $0x10] ss:$8 sps:$4 sm:$0xff]   ;;  %v3961_v40 = vld [vmem:[%s5242_s1 + $0x94] ss:$8 sps:$4 sm:$0xff]  }
  0x18   :  { %v423_v41 = vrot.slane %v409_v62, %v4323_v36  ;;  %v4483_v46 = vrot.slane %v207_v63, %v4323_v36  ;;  %v261_v8 = vrot.slane %v253_v2, %v4323_v36  ;;  %v425_v9 = vcombine.low %v71_v44, %v72_v45  ;;  %816 = vmatprep.subr.bf16.mxu0 %v3949_v11  ;;  %v3954_v44 = vld [vmem:[%s5242_s1 + $0x20] ss:$8 sps:$4 sm:$0xff]  }
  0x19   :  { %527 = vrot.lane.b32.xlu0 %v491_v3, %s4176_s27  ;;  %v492_v13 = vcombine.low %v4466_v1, %v4473_v6  ;;  %v568_v15 = vcombine.low %v393_v43, %v400_v50  ;;  %v426_v16 = vcombine.low %v73_v61, %v74_v42  ;;  %v254_v17 = vcombine.low %v72_v45, %v73_v61  ;;  %v3955_v45 = vld [vmem:[%s5242_s1 + $0x14] ss:$8 sps:$4 sm:$0xff]   ;;  %v3960_v3 = vld [vmem:[%s5242_s1] ss:$8 sps:$4 sm:$0xff]  }
  0x1a   :  { %603 = vrot.lane.b32.xlu1 %v567_v4, %s4175_s18  ;;  %v424_v21 = vcombine.low %v416_v5, %v423_v41  ;;  %v493_v22 = vcombine.low %v4483_v46, %v261_v8  ;;  %v433_v23 = vrot.slane %v425_v9, %v4323_v36  ;;  %v509_v25 = vcombine.low %v74_v42, %v75_v7  ;;  %v3963_v9 = vld [vmem:[%s5242_s1 + $0x90] ss:$8 sps:$4 sm:$0xff]   ;;  %v3966_v11 = vld [vmem:[%s5242_s1 + $0x80] ss:$8 sps:$4 sm:$0xff]  }
  0x1b   :  { %v500_v30 = vrot.slane %v492_v13, %v4323_v36  ;;  %v576_v31 = vrot.slane %v568_v15, %v4323_v36  ;;  %v440_v32 = vrot.slane %v426_v16, %v4323_v36  ;;  %v268_v33 = vrot.slane %v254_v17, %v4323_v36  ;;  %817 = vmatpush1.bf16.msra.mxu0 %v3951_v20 }
  0x1c   :  { %v507_v34 = vrot.slane %v493_v22, %v4323_v36  ;;  %v569_v35 = vcombine.low %v407_v51, %v433_v23  ;;  %v4513_v37 = vrot.slane %v509_v25, %v4323_v36  ;;  %v585_v38 = vcombine.low %v75_v7, %v76_v10  ;;  %818 = vmatprep.subr.bf16.mxu0 %v3952_v28 }
  0x1d   :  { %453 = vrot.lane.b32.xlu0 %v424_v21, %s4174_s17  ;;  %v441_v39 = vcombine.low %v433_v23, %v440_v32  ;;  %v269_v43 = vcombine.low %v261_v8, %v268_v33  ;;  %v139_v47 = vcombine.low %v4356_v53, %v4359_v54  ;;  %v613_v55 = vcombine.low %v76_v10, %v77_v27  ;;  %v3964_v10 = vld [vmem:[%s5242_s1 + $0x84] ss:$8 sps:$4 sm:$0xff]  }
  0x1e   :  { %v508_v48 = vcombine.low %v500_v30, %v507_v34  ;;  %v583_v49 = vrot.slane %v569_v35, %v4323_v36  ;;  %v517_v50 = vcombine.low %v268_v33, %v4513_v37  ;;  %v592_v51 = vrot.slane %v585_v38, %v4323_v36 }
  0x1f   :  { %v116_v56 = vrot.slane %v106_v24, %v4323_v36  ;;  %v448_v54 = vrot.slane %v441_v39, %v4323_v36  ;;  %v153_v60 = vrot.slane %v139_v47, %v4323_v36  ;;  %v187_v62 = vcombine.low %v4362_v58, %v4402_v18  ;;  %v3958_v24 = vld [vmem:[%s5242_s1 + $0x4] ss:$8 sps:$4 sm:$0xff]   ;;  %819 = vmatpush1.bf16.msra.mxu0 %v3954_v44 }
  0x20   :  { %529 = vrot.lane.b32.xlu1 %v508_v48, %s4176_s27  ;;  %v584_v53 = vcombine.low %v576_v31, %v583_v49  ;;  %v593_v57 = vcombine.low %v440_v32, %v592_v51  ;;  %v188_v0 = vcombine.low %v4405_v19, %v4415_v26  ;;  %v524_v14 = vrot.slane %v517_v50, %v4323_v36 }
  0x21   :  { %v138_v61 = vcombine.low %v116_v56, %v4353_v52  ;;  %v236_v63 = vcombine.low %v4422_v29, %v4466_v1  ;;  %v237_v52 = vcombine.low %v4473_v6, %v4483_v46  ;;  %v4552_v2 = vrot.slane %v269_v43, %v4323_v36  ;;  %820 = vmatprep.subr.bf16.mxu0 %v3955_v45 }
  0x22   :  { %605 = vrot.lane.b32.xlu0 %v584_v53, %s4175_s18  ;;  %v195_v18 = vrot.slane %v187_v62, %v4323_v36  ;;  %v202_v19 = vrot.slane %v188_v0, %v4323_v36  ;;  %v620_v26 = vrot.slane %v613_v55, %v4323_v36  ;;  %v600_v42 = vrot.slane %v593_v57, %v4323_v36 }
  0x23   :  { %v146_v58 = vrot.slane %v138_v61, %v4323_v36  ;;  %v244_v29 = vrot.slane %v236_v63, %v4323_v36  ;;  %v251_v1 = vrot.slane %v237_v52, %v4323_v36  ;;  %821 = vmatpush1.bf16.msra.mxu0 %v3957_v59 }
  0x24   :  { %455 = vrot.lane.b32.xlu1 %v448_v54, %s4174_s17  ;;  %v203_v5 = vcombine.low %v195_v18, %v202_v19  ;;  %v610_v6 = vcombine.low %v153_v60, %v195_v18  ;;  %v621_v7 = vcombine.low %v4513_v37, %v620_v26  ;;  %822 = vmatprep.subr.bf16.mxu0 %v3958_v24 }
  0x25   :  { %v154_v4 = vcombine.low %v146_v58, %v153_v60  ;;  %v611_v41 = vcombine.low %v202_v19, %v244_v29  ;;  %v252_v46 = vcombine.low %v244_v29, %v251_v1  ;;  %v612_v8 = vcombine.low %v251_v1, %v4552_v2 }
  0x26   :  { %531 = vrot.lane.b32.xlu0 %v524_v14, %s4176_s27  ;;  %3694 = vmatprep.mubr.msk.bf16.mxu0 %vm629_vm0, %v610_v6 }
  0x27   :  { %823 = vmatpush1.bf16.msra.mxu0 %v3960_v3 }
  0x28   :  { %607 = vrot.lane.b32.xlu1 %v600_v42, %s4175_s18  ;;  %836 = vmatprep.subr.bf16.mxu0 %v3961_v40 }
  0x2b   :  { %837 = vmatpush2.bf16.msra.mxu0 %v3963_v9 }
  0x2c   :  { %838 = vmatprep.subr.bf16.mxu0 %v3964_v10 }
  0x2f   :  { %839 = vmatpush2.bf16.msra.mxu0 %v3966_v11 }
  0x30   :  { %18 = vsyncpa [#allocation3], 0  ;;  %vm642_vm1 = vcmask 523264   ;;  %vm651_vm2 = vcmask 785408   ;;  %v628_v37 = vrot.slane %v621_v7, %v4323_v36  ;;  %v3967_v50 = vld [vmem:[%s5244_s3 + $0x38] sm:$0xff]   ;;  %v4177_v51 = vmov 0  }
  0x31   :  { %1757 = vmatprep.subr.bf16.mxu1 %v4177_v51  ;;  %v3968_v45 = vld [vmem:[%s5244_s3 + $0x30] sm:$0xff]   ;;  %v3969_v55 = vld [vmem:[%s5244_s3 + $0x28] sm:$0xff]   ;;  %v3970_v56 = vld [vmem:[%s5244_s3 + $0x20] sm:$0xff]   ;;  %vm1753_vm3 = vcmask 1043456   ;;  %v688_v14 = vsub.s32 0, %v4283_v12  ;;  %v692_v63 = vsub.s32 1, %v4283_v12 }
  0x32   :  { %1758 = vmatpush1.bf16.msra.mxu1 %v3967_v50  ;;  %v3971_v53 = vld [vmem:[%s5244_s3 + $0x18] sm:$0xff]   ;;  %v3972_v54 = vld [vmem:[%s5244_s3 + $0x10] sm:$0xff]   ;;  %v3973_v57 = vld [vmem:[%s5244_s3 + $0x8] sm:$0xff]   ;;  %vm1746_vm4 = vcmask 326656   ;;  %vm2500_vm5 = vcmask 1041408   ;;  %s4180_s16 = smov 40  }
  0x33   :  { %1759 = vmatprep.subr.bf16.mxu1 %v4177_v51  ;;  %v3974_v59 = vld [vmem:[%s5244_s3] sm:$0xff]   ;;  %v3975_v60 = vld [vmem:[%s5244_s3 + $0x50] ss:$0 sps:$4 sm:$0xff]   ;;  %v3976_v62 = vld [vmem:[%s5244_s3 + $0x48] sm:$0xff]   ;;  %s4181_s1 = smov 124   ;;  %s4182_s18 = smov 80  }
  0x34   :  { %v1755_v61 = vsel %vm1753_vm3, %v3975_v60, 0  ;;  %v3977_v0 = vld [vmem:[%s5244_s3 + $0x40] sm:$0xff]   ;;  %vm2151_vm6 = vcmask 1014784   ;;  %vm2138_vm7 = vcmask 687104   ;;  %vm2158_vm8 = vcmask 654336   ;;  %s4186_s30 = smov [#allocation2]  }
  0x35   :  { %v684_v24 = vld [vmem:[%s5243_s2] sm:$0x3]  ;;  %vm2495_vm9 = vcmask 293888   ;;  %vm3355_vm10 = vcmask 130048   ;;  %vm3141_vm11 = vcmask 916480   ;;  %vm4185_vm12 = vmmov 0  }
  0x36   :  { %1760 = vmatpush1.bf16.msra.mxu1 %v3968_v45  ;;  %v4651_v52 = vrot.slane %v684_v24, %v688_v14  ;;  %vm3510_vm13 = vcmask 982016   ;;  %s3666_s14 = sshll.u32 %s4186_s30, 4  ;;  %s3667_s14 = int_to_ptr.vmem [resolvable:$true] %s3666_s14 }
  0x37   :  { %1761 = vmatprep.subr.bf16.mxu1 %v4177_v51  ;;  %p4156_p1 = scmp.lt.s32.totalorder %s3667_s14, %s3667_s14 }
  0x3a   :  { %1762 = vmatpush1.bf16.msra.mxu1 %v3969_v55 }
  0x3b   :  { %1763 = vmatprep.subr.bf16.mxu1 %v4177_v51 }
  0x3e   :  { %1764 = vmatpush1.bf16.msra.mxu1 %v3970_v56 }
  0x3f   :  { %1765 = vmatprep.subr.bf16.mxu1 %v4177_v51 }
  0x42   :  { %1766 = vmatpush1.bf16.msra.mxu1 %v3971_v53 }
  0x43   :  { %1767 = vmatprep.subr.bf16.mxu1 %v4177_v51 }
  0x46   :  { %1768 = vmatpush1.bf16.msra.mxu1 %v3972_v54 }
  0x47   :  { %1769 = vmatprep.subr.bf16.mxu1 %v4177_v51 }
  0x4a   :  { %1770 = vmatpush1.bf16.msra.mxu1 %v3973_v57 }
  0x4b   :  { %1771 = vmatprep.subr.bf16.mxu1 %v4177_v51 }
  0x4e   :  { %1772 = vmatpush1.bf16.msra.mxu1 %v3974_v59 }
  0x4f   :  { %1783 = vmatprep.subr.bf16.mxu1 %v4177_v51 }
  0x52   :  { %1784 = vmatpush2.bf16.msra.mxu1 %v1755_v61 }
  0x53   :  { %1785 = vmatprep.subr.bf16.mxu1 %v4177_v51 }
  0x56   :  { %1786 = vmatpush2.bf16.msra.mxu1 %v3976_v62 }
  0x57   :  { %1787 = vmatprep.subr.bf16.mxu1 %v4177_v51 }
  0x5a   :  { %1788 = vmatpush2.bf16.msra.mxu1 %v3977_v0 }
  0x83   :  { %v450_v13 = vpop.permute.xlu0 %449 }
  0x84   :  { %v602_v15 = vpop.permute.xlu1 %601  ;;  %v632_v16 = vsel %vm629_vm0, %v154_v4, %v450_v13 }
  0x87   :  { %v526_v17 = vpop.permute.xlu0 %525 }
  0x88   :  { %v644_v20 = vsel %vm642_vm1, %v632_v16, %v526_v17  ;;  %v452_v21 = vpop.permute.xlu1 %451 }
  0x89   :  { %v653_v22 = vsel %vm651_vm2, %v644_v20, %v602_v15  ;;  %v635_v23 = vsel %vm629_vm0, %v203_v5, %v452_v21  ;;  %v4178_v15 = vmov 1983009808  }
  0x8a   :  { %841 = vmatmul.mubr.bf16.vlgmr.msra.gmra.mxu0 %v653_v22  ;;  %v952_v16 = vunpack.c.l.s4 %v4178_v15 }
  0x8b   :  { %v528_v25 = vpop.permute.xlu0 %527  ;;  %3695 = vmatprep.mubr.msk.bf16.mxu0 %vm629_vm0, %v611_v41 }
  0x8c   :  { %v646_v27 = vsel %vm642_vm1, %v635_v23, %v528_v25  ;;  %v604_v28 = vpop.permute.xlu1 %603 }
  0x8d   :  { %v656_v31 = vsel %vm651_vm2, %v646_v27, %v604_v28  ;;  %v953_v28 = vunpack.c.0.s8 %v952_v16 }
  0x8f   :  { %v454_v30 = vpop.permute.xlu0 %453 }
  0x90   :  { %v638_v33 = vsel %vm629_vm0, %v252_v46, %v454_v30 }
  0x92   :  { %851 = vmatmul.mubr.bf16.gmra.mxu0 %v656_v31  ;;  %v530_v32 = vpop.permute.xlu1 %529 }
  0x93   :  { %3696 = vmatprep.mubr.msk.bf16.mxu0 %vm629_vm0, %v612_v8  ;;  %v648_v34 = vsel %vm642_vm1, %v638_v33, %v530_v32 }
  0x94   :  { %v606_v35 = vpop.permute.xlu0 %605 }
  0x95   :  { %v659_v39 = vsel %vm651_vm2, %v648_v34, %v606_v35 }
  0x96   :  { %v456_v38 = vpop.permute.xlu1 %455 }
  0x97   :  { %v641_v43 = vsel %vm629_vm0, %v4552_v2, %v456_v38  ;;  %v4655_v2 = vrot.slane %v684_v24, %v692_v63 }
  0x98   :  { %v532_v44 = vpop.permute.xlu0 %531 }
  0x99   :  { %v650_v47 = vsel %vm642_vm1, %v641_v43, %v532_v44  ;;  %v4668_v44 = vsub.s32 %v953_v28, %v4283_v12 }
  0x9a   :  { %861 = vmatmul.mubr.bf16.gmra.mxu0 %v659_v39  ;;  %v608_v48 = vpop.permute.xlu1 %607 }
  0x9b   :  { %3697 = vmatprep.mubr.msk.bf16.mxu0 %vm629_vm0, %v628_v37  ;;  %v662_v49 = vsel %vm651_vm2, %v650_v47, %v608_v48 }
  0xa2   :  { %871 = vmatmul.mubr.bf16.gmra.mxu0 %v662_v49 }
 0x14a   :  { %v842_v58 = vpop.f32.mrf.mxu0 }
 0x14b   :  { %v843_v18 = vadd.f32 %v842_v58, %v4651_v52 }
 0x14c   :  { %v844_v19 = vpop.f32.mrf.mxu0 }
 0x14d   :  { %v879_v26 = vmul.f32 0.5, %v843_v18  ;;  %v845_v42 = vadd.f32 %v844_v19, %v4655_v2 }
 0x14e   :  { %v846_v29 = vpop.f32.mrf.mxu0 }
 0x14f   :  { %4107 = vtanh.f32 %v879_v26  ;;  %v880_v1 = vmul.f32 0.5, %v845_v42  ;;  %v847_v3 = vadd.f32 %v846_v29, %v4651_v52 }
 0x150   :  { %v848_v4 = vpop.f32.mrf.mxu0 }
 0x151   :  { %4109 = vtanh.f32 %v880_v1  ;;  %v881_v5 = vmul.f32 0.5, %v847_v3  ;;  %v849_v6 = vadd.f32 %v848_v4, %v4655_v2 }
 0x152   :  { %v852_v7 = vpop.f32.mrf.mxu0 }
 0x153   :  { %4111 = vtanh.f32 %v881_v5  ;;  %v882_v40 = vmul.f32 0.5, %v849_v6  ;;  %v853_v41 = vadd.f32 %v852_v7, %v4651_v52 }
 0x154   :  { %v854_v46 = vpop.f32.mrf.mxu0 }
 0x155   :  { %4113 = vtanh.f32 %v882_v40  ;;  %v883_v8 = vmul.f32 0.5, %v853_v41  ;;  %v855_v9 = vadd.f32 %v854_v46, %v4655_v2 }
 0x156   :  { %v856_v10 = vpop.f32.mrf.mxu0 }
 0x157   :  { %4115 = vtanh.f32 %v883_v8  ;;  %v884_v11 = vmul.f32 0.5, %v855_v9  ;;  %v857_v13 = vadd.f32 %v856_v10, %v4651_v52 }
 0x158   :  { %v858_v17 = vpop.f32.mrf.mxu0 }
 0x159   :  { %4117 = vtanh.f32 %v884_v11  ;;  %v885_v20 = vmul.f32 0.5, %v857_v13  ;;  %v859_v21 = vadd.f32 %v858_v17, %v4655_v2 }
 0x15a   :  { %v862_v22 = vpop.f32.mrf.mxu0 }
 0x15b   :  { %4119 = vtanh.f32 %v885_v20  ;;  %v886_v23 = vmul.f32 0.5, %v859_v21  ;;  %v863_v25 = vadd.f32 %v862_v22, %v4651_v52 }
 0x15c   :  { %v4108_v27 = vpop.eup %4107  ;;  %v864_v30 = vpop.f32.mrf.mxu0 }
 0x15d   :  { %v907_v31 = vmul.f32 0.5, %v4108_v27  ;;  %4121 = vtanh.f32 %v886_v23  ;;  %v887_v32 = vmul.f32 0.5, %v863_v25  ;;  %v865_v33 = vadd.f32 %v864_v30, %v4655_v2 }
 0x15e   :  { %v4110_v34 = vpop.eup %4109  ;;  %v866_v35 = vpop.f32.mrf.mxu0 }
 0x15f   :  { %v908_v37 = vmul.f32 0.5, %v4110_v34  ;;  %4123 = vtanh.f32 %v887_v32  ;;  %v888_v38 = vmul.f32 0.5, %v865_v33  ;;  %v921_v43 = vadd.f32 0.5, %v907_v31 }
 0x160   :  { %v4112_v39 = vpop.eup %4111  ;;  %v867_v47 = vadd.f32 %v866_v35, %v4651_v52  ;;  %v868_v48 = vpop.f32.mrf.mxu0 }
 0x161   :  { %v922_v49 = vadd.f32 0.5, %v908_v37  ;;  %v909_v50 = vmul.f32 0.5, %v4112_v39  ;;  %4125 = vtanh.f32 %v888_v38  ;;  %v869_v45 = vadd.f32 %v868_v48, %v4655_v2 }
 0x162   :  { %v4114_v55 = vpop.eup %4113  ;;  %v889_v56 = vmul.f32 0.5, %v867_v47  ;;  %v872_v53 = vpop.f32.mrf.mxu0 }
 0x163   :  { %v949_v54 = vcombine.low %v921_v43, %v922_v49  ;;  %v950_v57 = vcombine.high %v921_v43, %v922_v49  ;;  %v910_v59 = vmul.f32 0.5, %v4114_v55  ;;  %v890_v61 = vmul.f32 0.5, %v869_v45 }
 0x164   :  { %v4116_v60 = vpop.eup %4115  ;;  %4127 = vtanh.f32 %v889_v56  ;;  %v873_v62 = vadd.f32 %v872_v53, %v4651_v52  ;;  %v874_v0 = vpop.f32.mrf.mxu0  ;;  %v923_v18 = vadd.f32 0.5, %v909_v50 }
 0x165   :  { %v957_v24 = vrot.slane %v949_v54, %v4668_v44  ;;  %v964_v58 = vrot.slane %v950_v57, %v4668_v44  ;;  %v924_v19 = vadd.f32 0.5, %v910_v59  ;;  %v911_v42 = vmul.f32 0.5, %v4116_v60 }
 0x166   :  { %v4118_v26 = vpop.eup %4117  ;;  %4129 = vtanh.f32 %v890_v61  ;;  %v891_v29 = vmul.f32 0.5, %v873_v62  ;;  %v875_v1 = vadd.f32 %v874_v0, %v4655_v2  ;;  %v876_v3 = vpop.f32.mrf.mxu0 }
 0x167   :  { %v965_v4 = vcombine.high %v957_v24, %v957_v24  ;;  %v966_v5 = vcombine.high %v964_v58, %v964_v58  ;;  %v967_v6 = vcombine.low %v923_v18, %v924_v19  ;;  %v968_v7 = vcombine.high %v923_v18, %v924_v19 }
 0x168   :  { %v4120_v40 = vpop.eup %4119  ;;  %v912_v52 = vmul.f32 0.5, %v4118_v26  ;;  %4131 = vtanh.f32 %v891_v29  ;;  %v892_v41 = vmul.f32 0.5, %v875_v1  ;;  %v877_v46 = vpop.f32.mrf.mxu0  ;;  %v925_v15 = vadd.f32 0.5, %v911_v42 }
 0x169   :  { %v1103_v8 = vadd.f32 %v965_v4, %v957_v24  ;;  %v1104_v9 = vadd.f32 %v966_v5, %v964_v58  ;;  %v975_v10 = vrot.slane %v967_v6, %v4668_v44  ;;  %v982_v11 = vrot.slane %v968_v7, %v4668_v44 }
 0x16a   :  { %v4122_v13 = vpop.eup %4121  ;;  %v926_v16 = vadd.f32 0.5, %v912_v52  ;;  %v913_v2 = vmul.f32 0.5, %v4120_v40  ;;  %4133 = vtanh.f32 %v892_v41 }
 0x16b   :  { %v1137_v17 = vrot.slane %v1103_v8, %v4668_v44  ;;  %v4680_v20 = vrot.slane %v1104_v9, %v4668_v44  ;;  %v983_v21 = vcombine.high %v975_v10, %v975_v10  ;;  %v984_v22 = vcombine.high %v982_v11, %v982_v11 }
 0x16c   :  { %v4124_v23 = vpop.eup %4123  ;;  %v985_v25 = vcombine.low %v925_v15, %v926_v16  ;;  %v986_v27 = vcombine.high %v925_v15, %v926_v16  ;;  %v914_v28 = vmul.f32 0.5, %v4122_v13  ;;  %v927_v33 = vadd.f32 0.5, %v913_v2 }
 0x16d   :  { %v1138_v30 = vcombine.high %v1137_v17, %v1137_v17  ;;  %v1105_v31 = vadd.f32 %v983_v21, %v975_v10  ;;  %v1106_v32 = vadd.f32 %v984_v22, %v982_v11  ;;  %v915_v39 = vmul.f32 0.5, %v4124_v23 }
 0x16e   :  { %v4126_v34 = vpop.eup %4125  ;;  %v993_v35 = vrot.slane %v985_v25, %v4668_v44  ;;  %v1000_v37 = vrot.slane %v986_v27, %v4668_v44  ;;  %v928_v38 = vadd.f32 0.5, %v914_v28  ;;  %v1146_v43 = vcombine.high %v4680_v20, %v4680_v20 }
 0x16f   :  { %v1153_v47 = vrot.slane %v1105_v31, %v4668_v44  ;;  %v4688_v48 = vrot.slane %v1106_v32, %v4668_v44  ;;  %v916_v49 = vmul.f32 0.5, %v4126_v34  ;;  %v929_v57 = vadd.f32 0.5, %v915_v39 }
 0x170   :  { %v1001_v50 = vcombine.high %v993_v35, %v993_v35  ;;  %v1002_v45 = vcombine.high %v1000_v37, %v1000_v37  ;;  %v1003_v55 = vcombine.low %v927_v33, %v928_v38  ;;  %v1004_v56 = vcombine.high %v927_v33, %v928_v38 }
 0x171   :  { %v4128_v53 = vpop.eup %4127  ;;  %v1154_v54 = vcombine.high %v1153_v47, %v1153_v47  ;;  %v930_v59 = vadd.f32 0.5, %v916_v49  ;;  %v3698_v60 = vpack.c.bf16 %v1138_v30, %v1137_v17  ;;  %v1162_v18 = vcombine.high %v4688_v48, %v4688_v48 }
 0x172   :  { %v1107_v61 = vadd.f32 %v1001_v50, %v993_v35  ;;  %v1108_v62 = vadd.f32 %v1002_v45, %v1000_v37  ;;  %v1011_v0 = vrot.slane %v1003_v55, %v4668_v44  ;;  %v1018_v24 = vrot.slane %v1004_v56, %v4668_v44 }
 0x173   :  { %v4130_v58 = vpop.eup %4129  ;;  %v1021_v19 = vcombine.low %v929_v57, %v930_v59  ;;  %v1022_v26 = vcombine.high %v929_v57, %v930_v59  ;;  %v917_v42 = vmul.f32 0.5, %v4128_v53  ;;  %v1334_v52 = vrot.slane %v3698_v60, %v4323_v36 }
 0x174   :  { %v1169_v29 = vrot.slane %v1107_v61, %v4668_v44  ;;  %v4696_v1 = vrot.slane %v1108_v62, %v4668_v44  ;;  %v1019_v3 = vcombine.high %v1011_v0, %v1011_v0  ;;  %v1020_v4 = vcombine.high %v1018_v24, %v1018_v24 }
 0x175   :  { %v4132_v5 = vpop.eup %4131  ;;  %v1029_v6 = vrot.slane %v1021_v19, %v4668_v44  ;;  %v1036_v7 = vrot.slane %v1022_v26, %v4668_v44  ;;  %v918_v40 = vmul.f32 0.5, %v4130_v58  ;;  %v931_v9 = vadd.f32 0.5, %v917_v42 }
 0x176   :  { %v1170_v41 = vcombine.high %v1169_v29, %v1169_v29  ;;  %v1109_v46 = vadd.f32 %v1019_v3, %v1011_v0  ;;  %v1110_v8 = vadd.f32 %v1020_v4, %v1018_v24  ;;  %v919_v16 = vmul.f32 0.5, %v4132_v5 }
 0x177   :  { %v4134_v10 = vpop.eup %4133  ;;  %v1037_v11 = vcombine.high %v1029_v6, %v1029_v6  ;;  %v1038_v13 = vcombine.high %v1036_v7, %v1036_v7  ;;  %v932_v15 = vadd.f32 0.5, %v918_v40  ;;  %v1178_v2 = vcombine.high %v4696_v1, %v4696_v1 }
 0x178   :  { %v1185_v17 = vrot.slane %v1109_v46, %v4668_v44  ;;  %v4705_v21 = vrot.slane %v1110_v8, %v4668_v44  ;;  %v920_v22 = vmul.f32 0.5, %v4134_v10  ;;  %v933_v31 = vadd.f32 0.5, %v919_v16 }
 0x179   :  { %v1111_v23 = vadd.f32 %v1037_v11, %v1029_v6  ;;  %v1112_v25 = vadd.f32 %v1038_v13, %v1036_v7  ;;  %v1039_v27 = vcombine.low %v931_v9, %v932_v15  ;;  %v1040_v28 = vcombine.high %v931_v9, %v932_v15 }
 0x17a   :  { %v1186_v30 = vcombine.high %v1185_v17, %v1185_v17  ;;  %v934_v32 = vadd.f32 0.5, %v920_v22  ;;  %v4708_v33 = vrot.slane %v1334_v52, %v4323_v36  ;;  %v3699_v50 = vpack.c.bf16 %v1146_v43, %v4680_v20 }
 0x17b   :  { %v1201_v34 = vrot.slane %v1111_v23, %v4668_v44  ;;  %v1209_v35 = vrot.slane %v1112_v25, %v4668_v44  ;;  %v1047_v37 = vrot.slane %v1039_v27, %v4668_v44  ;;  %v1054_v38 = vrot.slane %v1040_v28, %v4668_v44 }
 0x17c   :  { %v1057_v39 = vcombine.low %v933_v31, %v934_v32  ;;  %v1058_v49 = vcombine.high %v933_v31, %v934_v32  ;;  %v3700_v45 = vpack.c.bf16 %v1154_v54, %v1153_v47  ;;  %v1349_v61 = vrot.slane %v3699_v50, %v4323_v36 }
 0x17d   :  { %v1202_v55 = vcombine.high %v1201_v34, %v1201_v34  ;;  %v1210_v56 = vcombine.high %v1209_v35, %v1209_v35  ;;  %v1055_v53 = vcombine.high %v1047_v37, %v1047_v37  ;;  %v1056_v57 = vcombine.high %v1054_v38, %v1054_v38 }
 0x17e   :  { %v1065_v59 = vrot.slane %v1057_v39, %v4668_v44  ;;  %v1072_v60 = vrot.slane %v1058_v49, %v4668_v44  ;;  %v1364_v62 = vrot.slane %v3700_v45, %v4323_v36  ;;  %v1194_v0 = vcombine.high %v4705_v21, %v4705_v21 }
 0x17f   :  { %v3706_v24 = vpack.c.bf16 %v1202_v55, %v1201_v34  ;;  %v1113_v58 = vadd.f32 %v1055_v53, %v1047_v37  ;;  %v1114_v19 = vadd.f32 %v1056_v57, %v1054_v38  ;;  %v3707_v20 = vpack.c.bf16 %v1210_v56, %v1209_v35 }
 0x180   :  { %v1073_v43 = vcombine.high %v1065_v59, %v1065_v59  ;;  %v1074_v47 = vcombine.high %v1072_v60, %v1072_v60  ;;  %v1356_v54 = vrot.slane %v1349_v61, %v4323_v36  ;;  %v1371_v4 = vrot.slane %v1364_v62, %v4323_v36 }
 0x181   :  { %v1454_v26 = vrot.slane %v3706_v24, %v4323_v36  ;;  %v1217_v42 = vrot.slane %v1113_v58, %v4668_v44  ;;  %v1225_v3 = vrot.slane %v1114_v19, %v4668_v44  ;;  %v3701_v7 = vpack.c.bf16 %v1162_v18, %v4688_v48 }
 0x182   :  { %v1115_v5 = vadd.f32 %v1073_v43, %v1065_v59  ;;  %v1116_v6 = vadd.f32 %v1074_v47, %v1072_v60  ;;  %v3702_v40 = vpack.c.bf16 %v1170_v41, %v1169_v29  ;;  %v3703_v8 = vpack.c.bf16 %v1178_v2, %v4696_v1 }
 0x183   :  { %v1218_v52 = vcombine.high %v1217_v42, %v1217_v42  ;;  %v1226_v46 = vcombine.high %v1225_v3, %v1225_v3  ;;  %v3704_v9 = vpack.c.bf16 %v1186_v30, %v1185_v17  ;;  %v1379_v13 = vrot.slane %v3701_v7, %v4323_v36 }
 0x184   :  { %v1233_v10 = vrot.slane %v1115_v5, %v4668_v44  ;;  %v1241_v11 = vrot.slane %v1116_v6, %v4668_v44  ;;  %v1394_v15 = vrot.slane %v3702_v40, %v4323_v36  ;;  %v1469_v16 = vrot.slane %v3707_v20, %v4323_v36 }
 0x185   :  { %v3708_v22 = vpack.c.bf16 %v1218_v52, %v1217_v42  ;;  %v3709_v23 = vpack.c.bf16 %v1226_v46, %v1225_v3  ;;  %v1409_v48 = vrot.slane %v3703_v8, %v4323_v36  ;;  %v1386_v41 = vrot.slane %v1379_v13, %v4323_v36 }
 0x186   :  { %v1234_v18 = vcombine.high %v1233_v10, %v1233_v10  ;;  %v1242_v29 = vcombine.high %v1241_v11, %v1241_v11  ;;  %v1424_v1 = vrot.slane %v3704_v9, %v4323_v36  ;;  %v1401_v25 = vrot.slane %v1394_v15, %v4323_v36 }
 0x187   :  { %v1484_v2 = vrot.slane %v3708_v22, %v4323_v36  ;;  %v1499_v17 = vrot.slane %v3709_v23, %v4323_v36  ;;  %v1416_v27 = vrot.slane %v1409_v48, %v4323_v36  ;;  %v3705_v31 = vpack.c.bf16 %v1194_v0, %v4705_v21  ;;  %v3978_v22 = vld [vmem:[%s5245_s4 + $0x70] ss:$8 sps:$4 sm:$0xff]   ;;  %v3980_v23 = vld [vmem:[%s5245_s4 + $0x74] ss:$8 sps:$4 sm:$0xff]   ;;  %v3983_v48 = vld [vmem:[%s5245_s4 + $0x64] ss:$8 sps:$4 sm:$0xff]  }
 0x188   :  { %v3710_v28 = vpack.c.bf16 %v1234_v18, %v1233_v10  ;;  %v3711_v30 = vpack.c.bf16 %v1242_v29, %v1241_v11  ;;  %v1558_v32 = vcombine.low %v4708_v33, %v1356_v54  ;;  %v1559_v34 = vcombine.low %v1371_v4, %v1386_v41  ;;  %2507 = vmatprep.subr.bf16.mxu0 %v3980_v23  ;;  %v3981_v18 = vld [vmem:[%s5245_s4 + $0x60] ss:$8 sps:$4 sm:$0xff]   ;;  %v3986_v29 = vld [vmem:[%s5245_s4 + $0x54] ss:$8 sps:$4 sm:$0xff]   ;;  %v3996_v41 = vld [vmem:[%s5245_s4 + $0x170] ss:$8 sps:$4 sm:$0xff]  }
 0x189   :  { %v1461_v35 = vrot.slane %v1454_v26, %v4323_v36  ;;  %v1476_v37 = vrot.slane %v1469_v16, %v4323_v36  ;;  %v1431_v49 = vrot.slane %v1424_v1, %v4323_v36  ;;  %v1439_v50 = vrot.slane %v3705_v31, %v4323_v36  ;;  %2508 = vmatpush1.bf16.msra.mxu0 %v3978_v22  ;;  %v3998_v1 = vld [vmem:[%s5245_s4 + $0x174] ss:$8 sps:$4 sm:$0xff]   ;;  %v4008_v31 = vld [vmem:[%s5245_s4 + $0x150] ss:$8 sps:$4 sm:$0xff]  }
 0x18a   :  { %v1514_v38 = vrot.slane %v3710_v28, %v4323_v36  ;;  %v1529_v39 = vrot.slane %v3711_v30, %v4323_v36  ;;  %v1560_v45 = vcombine.low %v1401_v25, %v1416_v27  ;;  %v1575_v55 = vrot.slane %v1559_v34, %v4323_v36  ;;  %2509 = vmatprep.subr.bf16.mxu0 %v3983_v48  ;;  %v4002_v25 = vld [vmem:[%s5245_s4 + $0x160] ss:$8 sps:$4 sm:$0xff]   ;;  %v3989_v27 = vld [vmem:[%s5245_s4 + $0x44] ss:$8 sps:$4 sm:$0xff]   ;;  %v4010_v28 = vld [vmem:[%s5245_s4 + $0x154] ss:$8 sps:$4 sm:$0xff]  }
 0x18b   :  { %v1491_v21 = vrot.slane %v1484_v2, %v4323_v36  ;;  %v1506_v33 = vrot.slane %v1499_v17, %v4323_v36  ;;  %v1446_v56 = vrot.slane %v1439_v50, %v4323_v36  ;;  %v1624_v59 = vcombine.low %v1461_v35, %v1476_v37  ;;  %v4004_v2 = vld [vmem:[%s5245_s4 + $0x164] ss:$8 sps:$4 sm:$0xff]   ;;  %2558 = vmatprep.subr.bf16.mxu1 %v3998_v1  ;;  %v3984_v17 = vld [vmem:[%s5245_s4 + $0x50] ss:$8 sps:$4 sm:$0xff]   ;;  %v3987_v30 = vld [vmem:[%s5245_s4 + $0x40] ss:$8 sps:$4 sm:$0xff]  }
 0x18c   :  { %v1521_v53 = vrot.slane %v1514_v38, %v4323_v36  ;;  %v1536_v57 = vrot.slane %v1529_v39, %v4323_v36  ;;  %v1568_v60 = vrot.slane %v1558_v32, %v4323_v36  ;;  %v1582_v43 = vrot.slane %v1560_v45, %v4323_v36  ;;  %v3992_v32 = vld [vmem:[%s5245_s4 + $0x34] ss:$8 sps:$4 sm:$0xff]   ;;  %v4016_v34 = vld [vmem:[%s5245_s4 + $0x144] ss:$8 sps:$4 sm:$0xff]   ;;  %v3990_v35 = vld [vmem:[%s5245_s4 + $0x30] ss:$8 sps:$4 sm:$0xff]  }
 0x18d   :  { %v1625_v61 = vcombine.low %v1491_v21, %v1506_v33  ;;  %v1561_v62 = vcombine.low %v1431_v49, %v1446_v56  ;;  %v1633_v19 = vrot.slane %v1624_v59, %v4323_v36  ;;  %2510 = vmatpush1.bf16.msra.mxu0 %v3981_v18  ;;  %v4014_v37 = vld [vmem:[%s5245_s4 + $0x140] ss:$8 sps:$4 sm:$0xff]   ;;  %v3995_v38 = vld [vmem:[%s5245_s4 + $0x24] ss:$8 sps:$4 sm:$0xff]   ;;  %v4022_v39 = vld [vmem:[%s5245_s4 + $0x134] ss:$8 sps:$4 sm:$0xff]  }
 0x18e   :  { %v1626_v0 = vcombine.low %v1521_v53, %v1536_v57  ;;  %v1591_v24 = vcombine.high %v1568_v60, %v1575_v55  ;;  %v1590_v58 = vcombine.low %v1568_v60, %v1575_v55  ;;  %2511 = vmatprep.subr.bf16.mxu0 %v3986_v29  ;;  %v3993_v49 = vld [vmem:[%s5245_s4 + $0x20] ss:$8 sps:$4 sm:$0xff]   ;;  %v4020_v50 = vld [vmem:[%s5245_s4 + $0x130] ss:$8 sps:$4 sm:$0xff]   ;;  %v4001_v45 = vld [vmem:[%s5245_s4 + $0x14] ss:$8 sps:$4 sm:$0xff]  }
 0x18f   :  { %v1640_v20 = vrot.slane %v1625_v61, %v4323_v36  ;;  %v1589_v47 = vrot.slane %v1561_v62, %v4323_v36  ;;  %v4028_v55 = vld [vmem:[%s5245_s4 + $0x124] ss:$8 sps:$4 sm:$0xff]   ;;  %v3999_v21 = vld [vmem:[%s5245_s4 + $0x10] ss:$8 sps:$4 sm:$0xff]   ;;  %v4026_v33 = vld [vmem:[%s5245_s4 + $0x120] ss:$8 sps:$4 sm:$0xff]  }
 0x190   :  { %v1647_v54 = vrot.slane %v1626_v0, %v4323_v36  ;;  %v1607_v5 = vrot.slane %v1591_v24, %v4323_v36  ;;  %v1600_v6 = vrot.slane %v1590_v58, %v4323_v36  ;;  %v4007_v56 = vld [vmem:[%s5245_s4 + $0x4] ss:$8 sps:$4 sm:$0xff]   ;;  %v4034_v53 = vld [vmem:[%s5245_s4 + $0x114] ss:$8 sps:$4 sm:$0xff]   ;;  %v4005_v57 = vld [vmem:[%s5245_s4] ss:$8 sps:$4 sm:$0xff]  }
 0x191   :  { %v1649_v26 = vcombine.high %v1633_v19, %v1640_v20  ;;  %v1593_v42 = vcombine.high %v1582_v43, %v1589_v47  ;;  %v1592_v3 = vcombine.low %v1582_v43, %v1589_v47  ;;  %v1648_v11 = vcombine.low %v1633_v19, %v1640_v20  ;;  %2512 = vmatpush1.bf16.msra.mxu0 %v3984_v17  ;;  %v4032_v59 = vld [vmem:[%s5245_s4 + $0x110] ss:$8 sps:$4 sm:$0xff]   ;;  %v4013_v60 = vld [vmem:[%s5245_s4 + $0xf4] ss:$8 sps:$4 sm:$0xff]   ;;  %v4040_v61 = vld [vmem:[%s5245_s4 + $0x104] ss:$8 sps:$4 sm:$0xff]  }
 0x192   :  { %v1650_v4 = vcombine.high %v1647_v54, %v1647_v54  ;;  %v1671_v13 = vrot.slane %v1647_v54, %v4323_v36  ;;  %2513 = vmatprep.subr.bf16.mxu0 %v3989_v27  ;;  %v2217_v62 = vld [vmem:[%s5245_s4 + $0x1a0] sm:$0x33]  ;;  %v4011_v0 = vld [vmem:[%s5245_s4 + $0xf0] ss:$8 sps:$4 sm:$0xff]   ;;  %v4025_v47 = vld [vmem:[%s5245_s4 + $0xd4] ss:$8 sps:$4 sm:$0xff]  }
 0x193   :  { %v1621_v7 = vrot.slane %v1593_v42, %v4323_v36  ;;  %v1614_v40 = vrot.slane %v1592_v3, %v4323_v36  ;;  %v1664_v52 = vrot.slane %v1649_v26, %v4323_v36  ;;  %v1657_v15 = vrot.slane %v1648_v11, %v4323_v36  ;;  %v4038_v24 = vld [vmem:[%s5245_s4 + $0x100] ss:$8 sps:$4 sm:$0xff]   ;;  %v4019_v58 = vld [vmem:[%s5245_s4 + $0xe4] ss:$8 sps:$4 sm:$0xff]   ;;  %v4051_v26 = vld [vmem:[%s5245_s4 + $0x194] ss:$8 sps:$4 sm:$0xff]  }
 0x194   :  { %v1678_v46 = vrot.slane %v1650_v4, %v4323_v36  ;;  %v3783_v19 = vcombine.high %v2217_v62, %v2217_v62  ;;  %v3782_v20 = vcombine.low %v2217_v62, %v2217_v62  ;;  %v4017_v43 = vld [vmem:[%s5245_s4 + $0xe0] ss:$8 sps:$4 sm:$0xff]   ;;  %v4023_v42 = vld [vmem:[%s5245_s4 + $0xd0] ss:$8 sps:$4 sm:$0xff]   ;;  %v4031_v4 = vld [vmem:[%s5245_s4 + $0xc4] ss:$8 sps:$4 sm:$0xff]  }
 0x195   :  { %v1623_v8 = vcombine.low %v1607_v5, %v1621_v7  ;;  %v1622_v9 = vcombine.low %v1600_v6, %v1614_v40  ;;  %v1679_v16 = vcombine.low %v1657_v15, %v1671_v13  ;;  %2514 = vmatpush1.bf16.msra.mxu0 %v3987_v30  ;;  %v4049_v3 = vld [vmem:[%s5245_s4 + $0x190] ss:$8 sps:$4 sm:$0xff]   ;;  %v4029_v5 = vld [vmem:[%s5245_s4 + $0xc0] ss:$8 sps:$4 sm:$0xff]   ;;  %v4037_v6 = vld [vmem:[%s5245_s4 + $0xb4] ss:$8 sps:$4 sm:$0xff]  }
 0x196   :  { %v1680_v10 = vcombine.low %v1664_v52, %v1678_v46  ;;  %2515 = vmatprep.subr.bf16.mxu0 %v3992_v32  ;;  %v2502_v54 = vsel %vm2500_vm5, %v3782_v20, 0  ;;  %v4035_v7 = vld [vmem:[%s5245_s4 + $0xb0] ss:$8 sps:$4 sm:$0xff]   ;;  %v4043_v40 = vld [vmem:[%s5245_s4 + $0xa4] ss:$8 sps:$4 sm:$0xff]  }
 0x197   :  { %3723 = vmatprep.mubr.msk.bf16.mxu1 %vm1746_vm4, %v1623_v8  ;;  %v4041_v52 = vld [vmem:[%s5245_s4 + $0xa0] ss:$8 sps:$4 sm:$0xff]   ;;  %v4048_v46 = vld [vmem:[%s5245_s4 + $0x94] ss:$8 sps:$4 sm:$0xff]   ;;  %v4046_v8 = vld [vmem:[%s5245_s4 + $0x90] ss:$8 sps:$4 sm:$0xff]  }
 0x198   :  { %1790 = vmatmul.mubr.bf16.vlgmr.msra.gmra.mxu1 %v1622_v9 }
 0x199   :  { %3724 = vmatprep.mubr.msk.bf16.mxu1 %vm1746_vm4, %v1680_v10  ;;  %2559 = vmatpush1.bf16.msra.mxu1 %v3996_v41 }
 0x19a   :  { %2560 = vmatprep.subr.bf16.mxu1 %v4004_v2  ;;  %2516 = vmatpush1.bf16.msra.mxu0 %v3990_v35 }
 0x19b   :  { %2517 = vmatprep.subr.bf16.mxu0 %v3995_v38 }
 0x19d   :  { %2561 = vmatpush1.bf16.msra.mxu1 %v4002_v25 }
 0x19e   :  { %2562 = vmatprep.subr.bf16.mxu1 %v4010_v28  ;;  %2518 = vmatpush1.bf16.msra.mxu0 %v3993_v49 }
 0x19f   :  { %2519 = vmatprep.subr.bf16.mxu0 %v4001_v45 }
 0x1a0   :  { %1798 = vmatmul.mubr.bf16.gmra.mxu1 %v1679_v16 }
 0x1a1   :  { %2563 = vmatpush1.bf16.msra.mxu1 %v4008_v31 }
 0x1a2   :  { %2564 = vmatprep.subr.bf16.mxu1 %v4016_v34  ;;  %2520 = vmatpush1.bf16.msra.mxu0 %v3999_v21 }
 0x1a3   :  { %2521 = vmatprep.subr.bf16.mxu0 %v4007_v56 }
 0x1a5   :  { %2565 = vmatpush1.bf16.msra.mxu1 %v4014_v37 }
 0x1a6   :  { %2566 = vmatprep.subr.bf16.mxu1 %v4022_v39  ;;  %2522 = vmatpush1.bf16.msra.mxu0 %v4005_v57 }
 0x1a7   :  { %2523 = vmatprep.subr.bf16.mxu0 %v4013_v60 }
 0x1a9   :  { %2567 = vmatpush1.bf16.msra.mxu1 %v4020_v50 }
 0x1aa   :  { %2568 = vmatprep.subr.bf16.mxu1 %v4028_v55  ;;  %2524 = vmatpush2.bf16.msra.mxu0 %v4011_v0  ;;  %v4052_v0 = vld [vmem:[%s5245_s4 + $0x80] ss:$8 sps:$4 sm:$0xff]  }
 0x1ab   :  { %2525 = vmatprep.subr.bf16.mxu0 %v4019_v58 }
 0x1ad   :  { %2569 = vmatpush1.bf16.msra.mxu1 %v4026_v33 }
 0x1ae   :  { %2570 = vmatprep.subr.bf16.mxu1 %v4034_v53  ;;  %2526 = vmatpush2.bf16.msra.mxu0 %v4017_v43 }
 0x1af   :  { %2527 = vmatprep.subr.bf16.mxu0 %v4025_v47  ;;  %v4055_v47 = vld [vmem:[%s5245_s4 + $0x180] ss:$8 sps:$4 sm:$0xff]  }
 0x1b1   :  { %2571 = vmatpush1.bf16.msra.mxu1 %v4032_v59 }
 0x1b2   :  { %2572 = vmatprep.subr.bf16.mxu1 %v4040_v61  ;;  %2528 = vmatpush2.bf16.msra.mxu0 %v4023_v42 }
 0x1b3   :  { %2529 = vmatprep.subr.bf16.mxu0 %v4031_v4 }
 0x1b5   :  { %2573 = vmatpush1.bf16.msra.mxu1 %v4038_v24  ;;  %v4054_v24 = vld [vmem:[%s5245_s4 + $0x84] ss:$8 sps:$4 sm:$0xff]  }
 0x1b6   :  { %3784 = vmatprep.subr.msk.bf16.mxu1 %vm2500_vm5, %v3783_v19  ;;  %2530 = vmatpush2.bf16.msra.mxu0 %v4029_v5 }
 0x1b7   :  { %2531 = vmatprep.subr.bf16.mxu0 %v4037_v6 }
 0x1b9   :  { %2585 = vmatpush2.bf16.msra.mxu1 %v2502_v54  ;;  %v4057_v54 = vld [vmem:[%s5245_s4 + $0x184] ss:$8 sps:$4 sm:$0xff]   ;;  %s4179_s4 = smov 84  }
 0x1ba   :  { %2586 = vmatprep.subr.bf16.mxu1 %v4051_v26  ;;  %2532 = vmatpush2.bf16.msra.mxu0 %v4035_v7 }
 0x1bb   :  { %2533 = vmatprep.subr.bf16.mxu0 %v4043_v40 }
 0x1bd   :  { %2587 = vmatpush2.bf16.msra.mxu1 %v4049_v3 }
 0x1be   :  { %2534 = vmatpush2.bf16.msra.mxu0 %v4041_v52  ;;  %2588 = vmatprep.subr.bf16.mxu1 %v4057_v54 }
 0x1bf   :  { %2535 = vmatprep.subr.bf16.mxu0 %v4048_v46 }
 0x1c1   :  { %2589 = vmatpush2.bf16.msra.mxu1 %v4055_v47 }
 0x1c2   :  { %2536 = vmatpush2.bf16.msra.mxu0 %v4046_v8  ;;  %2989 = vmatprep.subr.bf16.mxu1 %v4177_v51 }
 0x1c3   :  { %2537 = vmatprep.subr.bf16.mxu0 %v4054_v24 }
 0x1c6   :  { %2538 = vmatpush2.bf16.msra.mxu0 %v4052_v0 }
 0x258   :  { %v1791_v9 = vpop.f32.mrf.mxu1 }
 0x25a   :  { %v1793_v10 = vpop.f32.mrf.mxu1 }
 0x25c   :  { %v1794_v11 = vpop.f32.mrf.mxu1 }
 0x25d   :  { %v1806_v13 = vpack.c.bf16 %v1794_v11, %v1791_v9  ;;  %v3725_v15 = vpack.c.bf16 %v1794_v11, %v1794_v11 }
 0x25e   :  { %v1796_v16 = vpop.f32.mrf.mxu1 }
 0x25f   :  { %v1817_v22 = vrot.slane %v1806_v13, %v4323_v36  ;;  %v1824_v23 = vrot.slane %v3725_v15, %v4323_v36 }
 0x260   :  { %v1799_v48 = vpop.f32.mrf.mxu1 }
 0x261   :  { %v1825_v18 = vcombine.high %v1817_v22, %v1817_v22  ;;  %v1826_v29 = vcombine.high %v1824_v23, %v1824_v23  ;;  %v1833_v41 = vrot.slane %v1817_v22, %v4323_v36  ;;  %v1840_v1 = vrot.slane %v1824_v23, %v4323_v36 }
 0x262   :  { %v1801_v2 = vpop.f32.mrf.mxu1 }
 0x263   :  { %v1847_v17 = vrot.slane %v1825_v18, %v4323_v36  ;;  %v1854_v25 = vrot.slane %v1826_v29, %v4323_v36  ;;  %v1855_v27 = vcombine.high %v1833_v41, %v1833_v41  ;;  %v1856_v28 = vcombine.high %v1840_v1, %v1840_v1 }
 0x264   :  { %v1802_v30 = vpop.f32.mrf.mxu1 }
 0x265   :  { %v1906_v31 = vcombine.low %v1833_v41, %v1847_v17  ;;  %v1807_v32 = vpack.c.bf16 %v1802_v30, %v1799_v48  ;;  %v3726_v34 = vpack.c.bf16 %v1802_v30, %v1802_v30  ;;  %v1857_v37 = vcombine.high %v1847_v17, %v1847_v17 }
 0x266   :  { %v1804_v35 = vpop.f32.mrf.mxu1  ;;  %v1970_v38 = vcombine.low %v1847_v17, %v1855_v27  ;;  %v3727_v39 = vcombine.high %v1833_v41, %v1847_v17  ;;  %v1908_v50 = vcombine.low %v1840_v1, %v1854_v25  ;;  %v3728_v45 = vcombine.high %v1840_v1, %v1854_v25 }
 0x267   :  { %v1866_v49 = vrot.slane %v1807_v32, %v4323_v36  ;;  %v1971_v55 = vcombine.low %v1857_v37, %v1840_v1  ;;  %v1972_v21 = vcombine.low %v1854_v25, %v1856_v28  ;;  %v1873_v33 = vrot.slane %v3726_v34, %v4323_v36 }
 0x268   :  { %v1858_v57 = vcombine.high %v1854_v25, %v1854_v25  ;;  %v1980_v59 = vrot.slane %v1970_v38, %v4323_v36  ;;  %v1930_v61 = vrot.slane %v1908_v50, %v4323_v36  ;;  %v1937_v62 = vrot.slane %v3728_v45, %v4323_v36 }
 0x269   :  { %v1874_v56 = vcombine.high %v1866_v49, %v1866_v49  ;;  %v1882_v53 = vrot.slane %v1866_v49, %v4323_v36  ;;  %v1987_v60 = vrot.slane %v1971_v55, %v4323_v36  ;;  %v1923_v43 = vrot.slane %v3727_v39, %v4323_v36 }
 0x26a   :  { %v1994_v26 = vrot.slane %v1972_v21, %v4323_v36  ;;  %v1916_v42 = vrot.slane %v1906_v31, %v4323_v36  ;;  %v1939_v6 = vcombine.low %v1930_v61, %v1937_v62  ;;  %v1875_v40 = vcombine.high %v1873_v33, %v1873_v33 }
 0x26b   :  { %v1896_v58 = vrot.slane %v1874_v56, %v4323_v36  ;;  %v1904_v19 = vcombine.high %v1882_v53, %v1882_v53  ;;  %v1973_v20 = vcombine.low %v1858_v57, %v1882_v53  ;;  %v2002_v5 = vcombine.low %v1980_v59, %v1987_v60 }
 0x26c   :  { %v2038_v8 = vcombine.low %v1923_v43, %v1930_v61  ;;  %v2074_v10 = vcombine.low %v1987_v60, %v1994_v26  ;;  %v1938_v13 = vcombine.low %v1916_v42, %v1923_v43  ;;  %v1953_v23 = vrot.slane %v1939_v6, %v4323_v36  ;;  %v4060_v6 = vld [vmem:[%s5247_s6 + $0x28] sm:$0xff]  }
 0x26d   :  { %v1955_v3 = vcombine.low %v1882_v53, %v1896_v58  ;;  %v2001_v4 = vrot.slane %v1973_v20, %v4323_v36  ;;  %v2019_v7 = vcombine.low %v1896_v58, %v1904_v19  ;;  %v3729_v11 = vcombine.high %v1882_v53, %v1896_v58 }
 0x26e   :  { %v2010_v15 = vrot.slane %v2002_v5, %v4323_v36  ;;  %v1905_v48 = vcombine.high %v1896_v58, %v1896_v58  ;;  %v2046_v1 = vrot.slane %v2038_v8, %v4323_v36  ;;  %v1946_v17 = vrot.slane %v1938_v13, %v4323_v36  ;;  %v4059_v5 = vld [vmem:[%s5247_s6 + $0x30] sm:$0xff]   ;;  %v4065_v8 = vld [vmem:[%s5247_s6] sm:$0xff]  }
 0x26f   :  { %v2003_v52 = vcombine.low %v1994_v26, %v2001_v4  ;;  %v4953_v46 = vrot.slane %v1955_v3, %v4323_v36  ;;  %v2026_v9 = vrot.slane %v2019_v7, %v4323_v36  ;;  %v2062_v29 = vrot.slane %v3729_v11, %v4323_v36  ;;  %v4061_v7 = vld [vmem:[%s5247_s6 + $0x20] sm:$0xff]  }
 0x270   :  { %v1889_v25 = vrot.slane %v1873_v33, %v4323_v36  ;;  %v1903_v30 = vrot.slane %v1875_v40, %v4323_v36  ;;  %v2082_v32 = vrot.slane %v2074_v10, %v4323_v36  ;;  %v1954_v34 = vcombine.low %v1946_v17, %v1953_v23  ;;  %v4062_v40 = vld [vmem:[%s5247_s6 + $0x18] sm:$0xff]   ;;  %v4067_v10 = vld [vmem:[%s5247_s6 + $0x40] sm:$0xff]  }
 0x271   :  { %v2017_v16 = vrot.slane %v2003_v52, %v4323_v36  ;;  %v2039_v22 = vcombine.low %v1937_v62, %v4953_v46  ;;  %v2075_v18 = vcombine.low %v2001_v4, %v2026_v9  ;;  %v2110_v28 = vcombine.low %v4953_v46, %v2062_v29  ;;  %v4058_v4 = vld [vmem:[%s5247_s6 + $0x38] sm:$0xff]   ;;  %v4063_v52 = vld [vmem:[%s5247_s6 + $0x10] sm:$0xff]   ;;  %v2218_v11 = vld [vmem:[%s5246_s5] sm:$0x3] }
 0x272   :  { %v2091_v37 = vcombine.low %v1905_v48, %v1889_v25  ;;  %v2119_v39 = vcombine.low %v1889_v25, %v1903_v30  ;;  %v2033_v50 = vrot.slane %v2026_v9, %v4323_v36  ;;  %v2069_v55 = vrot.slane %v2062_v29, %v4323_v36  ;;  %v4066_v9 = vld [vmem:[%s5247_s6 + $0x48] sm:$0xff]  }
 0x273   :  { %v2018_v41 = vcombine.low %v2010_v15, %v2017_v16  ;;  %v2053_v2 = vrot.slane %v2039_v22, %v4323_v36  ;;  %v2089_v27 = vrot.slane %v2075_v18, %v4323_v36  ;;  %v2117_v35 = vrot.slane %v2110_v28, %v4323_v36 }
 0x274   :  { %v2098_v45 = vrot.slane %v2091_v37, %v4323_v36  ;;  %v2126_v21 = vrot.slane %v2119_v39, %v4323_v36  ;;  %v1969_v47 = vrot.slane %v4953_v46, %v4323_v36  ;;  %v4064_v46 = vld [vmem:[%s5247_s6 + $0x8] sm:$0xff]   ;;  %v2223_v13 = vrot.slane %v2218_v11, %v688_v14 }
 0x275   :  { %2034 = vrot.lane.b32.xlu0 %v2018_v41, %s4179_s4  ;;  %v2054_v31 = vcombine.low %v2046_v1, %v2053_v2  ;;  %v2090_v38 = vcombine.low %v2082_v32, %v2089_v27  ;;  %v2118_v49 = vcombine.low %v1953_v23, %v2117_v35  ;;  %v2227_v15 = vrot.slane %v2218_v11, %v692_v63 }
 0x276   :  { %v2105_v33 = vrot.slane %v2098_v45, %v4323_v36  ;;  %v2133_v56 = vrot.slane %v2126_v21, %v4323_v36 }
 0x277   :  { %2070 = vrot.lane.b32.xlu1 %v2054_v31, %s4180_s16 }
 0x279   :  { %2106 = vrot.lane.b32.xlu0 %v2090_v38, %s4181_s1 }
 0x27b   :  { %2134 = vrot.lane.b32.xlu1 %v2118_v49, %s4182_s18 }
 0x27d   :  { %2036 = vrot.lane.b32.xlu0 %v2033_v50, %s4179_s4 }
 0x27f   :  { %2072 = vrot.lane.b32.xlu1 %v2069_v55, %s4180_s16 }
 0x281   :  { %2108 = vrot.lane.b32.xlu0 %v2105_v33, %s4181_s1 }
 0x283   :  { %2136 = vrot.lane.b32.xlu1 %v2133_v56, %s4182_s18 }
 0x2e7   :  { %v2035_v53 = vpop.permute.xlu0 %2034 }
 0x2e8   :  { %v2141_v62 = vsel %vm2138_vm7, %v1954_v34, %v2035_v53 }
 0x2e9   :  { %v2071_v57 = vpop.permute.xlu1 %2070 }
 0x2ea   :  { %v2148_v59 = vsel %vm1746_vm4, %v2035_v53, %v2071_v57 }
 0x2eb   :  { %v2107_v60 = vpop.permute.xlu0 %2106 }
 0x2ec   :  { %v2153_v61 = vsel %vm2151_vm6, %v2148_v59, %v2107_v60 }
 0x2ed   :  { %2539 = vmatprep.mubr.bf16.mxu0 %v2153_v61  ;;  %v2135_v0 = vpop.permute.xlu1 %2134 }
 0x2ee   :  { %v2160_v24 = vsel %vm2158_vm8, %v2107_v60, %v2135_v0  ;;  %2540 = vmatmul.mubr.bf16.vlgmr.msra.gmra.mxu0 %v2141_v62  ;;  %3785 = vmatprep.mubr.msk.bf16.mxu1 %vm2495_vm9, %v2135_v0 }
 0x2ef   :  { %v2037_v58 = vpop.permute.xlu0 %2036  ;;  %2591 = vmatmul.mubr.bf16.vlgmr.msra.gmra.mxu1 %v2160_v24 }
 0x2f0   :  { %v2145_v42 = vsel %vm2138_vm7, %v1969_v47, %v2037_v58  ;;  %2990 = vmatpush1.bf16.msra.mxu1 %v4058_v4 }
 0x2f1   :  { %v2073_v19 = vpop.permute.xlu1 %2072  ;;  %2991 = vmatprep.subr.bf16.mxu1 %v4177_v51 }
 0x2f2   :  { %v2150_v20 = vsel %vm1746_vm4, %v2037_v58, %v2073_v19 }
 0x2f3   :  { %v2109_v43 = vpop.permute.xlu0 %2108 }
 0x2f4   :  { %v2156_v54 = vsel %vm2151_vm6, %v2150_v20, %v2109_v43  ;;  %2992 = vmatpush1.bf16.msra.mxu1 %v4059_v5 }
 0x2f5   :  { %v2137_v26 = vpop.permute.xlu1 %2136  ;;  %2549 = vmatprep.mubr.bf16.mxu0 %v2156_v54  ;;  %2993 = vmatprep.subr.bf16.mxu1 %v4177_v51 }
 0x2f6   :  { %2550 = vmatmul.mubr.bf16.gmra.mxu0 %v2145_v42  ;;  %3786 = vmatprep.mubr.msk.bf16.mxu1 %vm2495_vm9, %v2137_v26  ;;  %v2163_v3 = vsel %vm2158_vm8, %v2109_v43, %v2137_v26 }
 0x2f7   :  { %2601 = vmatmul.mubr.bf16.gmra.mxu1 %v2163_v3 }
 0x2f8   :  { %2994 = vmatpush1.bf16.msra.mxu1 %v4060_v6 }
 0x2f9   :  { %2995 = vmatprep.subr.bf16.mxu1 %v4177_v51 }
 0x2fc   :  { %2996 = vmatpush1.bf16.msra.mxu1 %v4061_v7 }
 0x2fd   :  { %2997 = vmatprep.subr.bf16.mxu1 %v4177_v51 }
 0x300   :  { %2998 = vmatpush1.bf16.msra.mxu1 %v4062_v40 }
 0x301   :  { %2999 = vmatprep.subr.bf16.mxu1 %v4177_v51 }
 0x304   :  { %3000 = vmatpush1.bf16.msra.mxu1 %v4063_v52 }
 0x305   :  { %3001 = vmatprep.subr.bf16.mxu1 %v4177_v51 }
 0x308   :  { %3002 = vmatpush1.bf16.msra.mxu1 %v4064_v46 }
 0x309   :  { %3003 = vmatprep.subr.bf16.mxu1 %v4177_v51 }
 0x30c   :  { %3004 = vmatpush1.bf16.msra.mxu1 %v4065_v8 }
 0x30d   :  { %3017 = vmatprep.subr.bf16.mxu1 %v4177_v51 }
 0x310   :  { %3018 = vmatpush2.bf16.msra.mxu1 %v4066_v9 }
 0x311   :  { %3019 = vmatprep.subr.bf16.mxu1 %v4177_v51 }
 0x314   :  { %3020 = vmatpush2.bf16.msra.mxu1 %v4067_v10 }
 0x315   :  { %3398 = vmatprep.subr.bf16.mxu1 %v4177_v51 }
 0x3ae   :  { %v2541_v16 = vpop.f32.mrf.mxu0 }
 0x3af   :  { %v2542_v22 = vadd.f32 %v2541_v16, %v2223_v13  ;;  %v2592_v23 = vpop.f32.mrf.mxu1 }
 0x3b0   :  { %v2543_v48 = vpop.f32.mrf.mxu0 }
 0x3b1   :  { %v2593_v18 = vadd.f32 %v2592_v23, %v2542_v22  ;;  %v2544_v29 = vadd.f32 %v2543_v48, %v2227_v15  ;;  %v2594_v41 = vpop.f32.mrf.mxu1 }
 0x3b2   :  { %v2545_v1 = vpop.f32.mrf.mxu0 }
 0x3b3   :  { %v2609_v2 = vmul.f32 0.5, %v2593_v18  ;;  %v2595_v17 = vadd.f32 %v2594_v41, %v2544_v29  ;;  %v2546_v25 = vadd.f32 %v2545_v1, %v2223_v13  ;;  %v2596_v27 = vpop.f32.mrf.mxu1 }
 0x3b4   :  { %v2547_v28 = vpop.f32.mrf.mxu0 }
 0x3b5   :  { %4135 = vtanh.f32 %v2609_v2  ;;  %v2610_v30 = vmul.f32 0.5, %v2595_v17  ;;  %v2597_v31 = vadd.f32 %v2596_v27, %v2546_v25  ;;  %v2548_v14 = vadd.f32 %v2547_v28, %v2227_v15  ;;  %v2598_v32 = vpop.f32.mrf.mxu1 }
 0x3b6   :  { %v2551_v12 = vpop.f32.mrf.mxu0 }
 0x3b7   :  { %4137 = vtanh.f32 %v2610_v30  ;;  %v2611_v63 = vmul.f32 0.5, %v2597_v31  ;;  %v2599_v34 = vadd.f32 %v2598_v32, %v2548_v14  ;;  %v2552_v35 = vadd.f32 %v2551_v12, %v2223_v13  ;;  %v2602_v37 = vpop.f32.mrf.mxu1 }
 0x3b8   :  { %v2553_v38 = vpop.f32.mrf.mxu0 }
 0x3b9   :  { %4139 = vtanh.f32 %v2611_v63  ;;  %v2612_v39 = vmul.f32 0.5, %v2599_v34  ;;  %v2603_v49 = vadd.f32 %v2602_v37, %v2552_v35  ;;  %v2554_v50 = vadd.f32 %v2553_v38, %v2227_v15  ;;  %v2604_v45 = vpop.f32.mrf.mxu1 }
 0x3ba   :  { %v2555_v55 = vpop.f32.mrf.mxu0 }
 0x3bb   :  { %4141 = vtanh.f32 %v2612_v39  ;;  %v2613_v21 = vmul.f32 0.5, %v2603_v49  ;;  %v2605_v33 = vadd.f32 %v2604_v45, %v2554_v50  ;;  %v2606_v56 = vpop.f32.mrf.mxu1 }
 0x3bc   :  { %v2556_v53 = vpop.f32.mrf.mxu0 }
 0x3bd   :  { %4143 = vtanh.f32 %v2613_v21  ;;  %v2614_v57 = vmul.f32 0.5, %v2605_v33  ;;  %v2607_v59 = vpop.f32.mrf.mxu1 }
 0x3bf   :  { %4145 = vtanh.f32 %v2614_v57 }
 0x3c2   :  { %v4136_v60 = vpop.eup %4135 }
 0x3c3   :  { %v2621_v61 = vmul.f32 0.5, %v4136_v60 }
 0x3c4   :  { %v4138_v62 = vpop.eup %4137 }
 0x3c5   :  { %v2622_v0 = vmul.f32 0.5, %v4138_v62  ;;  %v2627_v58 = vadd.f32 0.5, %v2621_v61 }
 0x3c6   :  { %v4140_v24 = vpop.eup %4139 }
 0x3c7   :  { %v2628_v19 = vadd.f32 0.5, %v2622_v0  ;;  %v2623_v20 = vmul.f32 0.5, %v4140_v24 }
 0x3c8   :  { %v4142_v43 = vpop.eup %4141 }
 0x3c9   :  { %v2639_v47 = vcombine.low %v2627_v58, %v2628_v19  ;;  %v2640_v54 = vcombine.high %v2627_v58, %v2628_v19  ;;  %v2624_v26 = vmul.f32 0.5, %v4142_v43  ;;  %v2629_v5 = vadd.f32 0.5, %v2623_v20 }
 0x3ca   :  { %v4144_v42 = vpop.eup %4143 }
 0x3cb   :  { %v2647_v3 = vrot.slane %v2639_v47, %v4668_v44  ;;  %v2654_v4 = vrot.slane %v2640_v54, %v4668_v44  ;;  %v2630_v6 = vadd.f32 0.5, %v2624_v26  ;;  %v2625_v40 = vmul.f32 0.5, %v4144_v42 }
 0x3cc   :  { %v4146_v7 = vpop.eup %4145 }
 0x3cd   :  { %v2655_v52 = vcombine.high %v2647_v3, %v2647_v3  ;;  %v2656_v46 = vcombine.high %v2654_v4, %v2654_v4  ;;  %v2657_v8 = vcombine.low %v2629_v5, %v2630_v6  ;;  %v2658_v9 = vcombine.high %v2629_v5, %v2630_v6  ;;  %v4068_v5 = vld [vmem:[%s5248_s7 + $0xb8] sm:$0xff]  }
 0x3ce   :  { %v2626_v10 = vmul.f32 0.5, %v4146_v7  ;;  %v2631_v22 = vadd.f32 0.5, %v2625_v40  ;;  %v4069_v6 = vld [vmem:[%s5248_s7 + $0x78] sm:$0xff]   ;;  %v4072_v40 = vld [vmem:[%s5248_s7 + $0x70] sm:$0xff]  }
 0x3cf   :  { %v2694_v11 = vadd.f32 %v2655_v52, %v2647_v3  ;;  %v2695_v13 = vadd.f32 %v2656_v46, %v2654_v4  ;;  %v2665_v15 = vrot.slane %v2657_v8, %v4668_v44  ;;  %v2672_v16 = vrot.slane %v2658_v9, %v4668_v44  ;;  %v4071_v7 = vld [vmem:[%s5248_s7 + $0x38] sm:$0xff]   ;;  %3849 = vmatprep.subr.bf16.mxu0 %v4069_v6  ;;  %v4070_v52 = vld [vmem:[%s5248_s7 + $0xb0] sm:$0xff]   ;;  %v4075_v8 = vld [vmem:[%s5248_s7 + $0x68] sm:$0xff]  }
 0x3d0   :  { %v2632_v23 = vadd.f32 0.5, %v2626_v10  ;;  %3850 = vmatpush3.bf16.msra.mxu0 %v4071_v7  ;;  %v4074_v46 = vld [vmem:[%s5248_s7 + $0x30] sm:$0xff]   ;;  %v4073_v9 = vld [vmem:[%s5248_s7 + $0xa8] sm:$0xff]  }
 0x3d1   :  { %v2710_v48 = vrot.slane %v2694_v11, %v4668_v44  ;;  %v2718_v18 = vrot.slane %v2695_v13, %v4668_v44  ;;  %v2673_v29 = vcombine.high %v2665_v15, %v2665_v15  ;;  %v2674_v41 = vcombine.high %v2672_v16, %v2672_v16  ;;  %3851 = vmatprep.subr.bf16.mxu0 %v4072_v40  ;;  %v4077_v10 = vld [vmem:[%s5248_s7 + $0x28] sm:$0xff]   ;;  %v4078_v11 = vld [vmem:[%s5248_s7 + $0x60] sm:$0xff]  }
 0x3d2   :  { %v2675_v1 = vcombine.low %v2631_v22, %v2632_v23  ;;  %v4076_v13 = vld [vmem:[%s5248_s7 + $0xa0] sm:$0xff]   ;;  %v4079_v22 = vld [vmem:[%s5248_s7 + $0x98] sm:$0xff]  }
 0x3d3   :  { %v2711_v2 = vcombine.high %v2710_v48, %v2710_v48  ;;  %v2719_v17 = vcombine.high %v2718_v18, %v2718_v18  ;;  %v2696_v25 = vadd.f32 %v2673_v29, %v2665_v15  ;;  %v2697_v27 = vadd.f32 %v2674_v41, %v2672_v16  ;;  %v4080_v15 = vld [vmem:[%s5248_s7 + $0x20] sm:$0xff]   ;;  %v4081_v16 = vld [vmem:[%s5248_s7 + $0x58] sm:$0xff]   ;;  %v4086_v29 = vld [vmem:[%s5248_s7 + $0x10] sm:$0xff]  }
 0x3d4   :  { %v2682_v28 = vrot.slane %v2675_v1, %v4668_v44  ;;  %3852 = vmatpush3.bf16.msra.mxu0 %v4074_v46  ;;  %v4083_v23 = vld [vmem:[%s5248_s7 + $0x18] sm:$0xff]   ;;  %v4087_v41 = vld [vmem:[%s5248_s7 + $0x48] sm:$0xff]  }
 0x3d5   :  { %v3787_v30 = vpack.c.bf16 %v2711_v2, %v2710_v48  ;;  %v3788_v31 = vpack.c.bf16 %v2719_v17, %v2718_v18  ;;  %v2726_v14 = vrot.slane %v2696_v25, %v4668_v44  ;;  %v2734_v32 = vrot.slane %v2697_v27, %v4668_v44  ;;  %3853 = vmatprep.subr.bf16.mxu0 %v4075_v8  ;;  %v4084_v48 = vld [vmem:[%s5248_s7 + $0x50] sm:$0xff]   ;;  %v4085_v1 = vld [vmem:[%s5248_s7 + $0x88] sm:$0xff]   ;;  %v4088_v17 = vld [vmem:[%s5248_s7 + $0x80] sm:$0xff]  }
 0x3d6   :  { %v2683_v12 = vcombine.high %v2682_v28, %v2682_v28  ;;  %v4082_v18 = vld [vmem:[%s5248_s7 + $0x90] sm:$0xff]   ;;  %v4089_v2 = vld [vmem:[%s5248_s7 + $0x8] sm:$0xff]  }
 0x3d7   :  { %v2781_v63 = vrot.slane %v3787_v30, %v4323_v36  ;;  %v2796_v34 = vrot.slane %v3788_v31, %v4323_v36  ;;  %v2727_v35 = vcombine.high %v2726_v14, %v2726_v14  ;;  %v2735_v37 = vcombine.high %v2734_v32, %v2734_v32  ;;  %v4090_v30 = vld [vmem:[%s5248_s7 + $0x40] sm:$0xff]  }
 0x3d8   :  { %v2698_v38 = vadd.f32 %v2683_v12, %v2682_v28  ;;  %3854 = vmatpush3.bf16.msra.mxu0 %v4077_v10  ;;  %v4091_v31 = vld [vmem:[%s5248_s7 + $0xc0] sm:$0xff]  }
 0x3d9   :  { %v3789_v39 = vpack.c.bf16 %v2727_v35, %v2726_v14  ;;  %v3790_v49 = vpack.c.bf16 %v2735_v37, %v2734_v32  ;;  %v2788_v50 = vrot.slane %v2781_v63, %v4323_v36  ;;  %v2803_v45 = vrot.slane %v2796_v34, %v4323_v36  ;;  %3855 = vmatprep.subr.bf16.mxu0 %v4078_v11  ;;  %v4092_v14 = vld [vmem:[%s5248_s7] sm:$0xff]   ;;  %s4183_s7 = smov 112  }
 0x3da   :  { %v2742_v55 = vrot.slane %v2698_v38, %v4668_v44 }
 0x3db   :  { %v2811_v21 = vrot.slane %v3789_v39, %v4323_v36  ;;  %v2826_v33 = vrot.slane %v3790_v49, %v4323_v36  ;;  %v2869_v59 = vcombine.low %v2788_v50, %v2803_v45 }
 0x3dc   :  { %v2743_v56 = vcombine.high %v2742_v55, %v2742_v55  ;;  %3856 = vmatpush3.bf16.msra.mxu0 %v4080_v15 }
 0x3dd   :  { %v2818_v53 = vrot.slane %v2811_v21, %v4323_v36  ;;  %v2833_v57 = vrot.slane %v2826_v33, %v4323_v36  ;;  %v2877_v0 = vrot.slane %v2869_v59, %v4323_v36  ;;  %3857 = vmatprep.subr.bf16.mxu0 %v4081_v16 }
 0x3de   :  { %v3791_v60 = vpack.c.bf16 %v2743_v56, %v2742_v55 }
 0x3df   :  { %v2870_v61 = vcombine.low %v2818_v53, %v2833_v57 }
 0x3e0   :  { %v2841_v62 = vrot.slane %v3791_v60, %v4323_v36  ;;  %3858 = vmatpush3.bf16.msra.mxu0 %v4083_v23 }
 0x3e1   :  { %v2884_v24 = vrot.slane %v2870_v61, %v4323_v36  ;;  %3859 = vmatprep.subr.bf16.mxu0 %v4084_v48 }
 0x3e2   :  { %v2848_v44 = vrot.slane %v2841_v62, %v4323_v36 }
 0x3e3   :  { %v2892_v58 = vcombine.low %v2877_v0, %v2884_v24  ;;  %v2893_v20 = vcombine.high %v2877_v0, %v2884_v24 }
 0x3e4   :  { %v2891_v19 = vrot.slane %v2848_v44, %v4323_v36  ;;  %3860 = vmatpush3.bf16.msra.mxu0 %v4086_v29 }
 0x3e5   :  { %v2901_v47 = vrot.slane %v2892_v58, %v4323_v36  ;;  %v2908_v26 = vrot.slane %v2893_v20, %v4323_v36  ;;  %3861 = vmatprep.subr.bf16.mxu0 %v4087_v41  ;;  %v4093_v20 = vld [vmem:[%s5250_s9 + $0x38] ss:$0 sps:$4 sm:$0xff]   ;;  %v4101_v41 = vld [vmem:[%s5252_s11 + $0x28] ss:$0 sps:$4 sm:$0x33]  }
 0x3e6   :  { %v2894_v43 = vcombine.high %v2891_v19, %v2891_v19  ;;  %v2915_v54 = vrot.slane %v2891_v19, %v4323_v36 }
 0x3e8   :  { %v2922_v42 = vrot.slane %v2894_v43, %v4323_v36  ;;  %v2923_v4 = vcombine.low %v2901_v47, %v2915_v54  ;;  %3862 = vmatpush3.bf16.msra.mxu0 %v4089_v2  ;;  %v3515_v43 = vsel %vm1753_vm3, %v4093_v20, 0  ;;  %v4094_v47 = vld [vmem:[%s5250_s9 + $0x30] sm:$0xff]   ;;  %v4095_v54 = vld [vmem:[%s5250_s9 + $0x28] sm:$0xff]   ;;  %v4102_v2 = vld [vmem:[%s5252_s11 + $0x20] sm:$0xff]  }
 0x3e9   :  { %3863 = vmatprep.subr.bf16.mxu0 %v4090_v30  ;;  %v3831_v30 = vld [vmem:[%s5251_s10] ss:$0 sm:$0xff]  ;;  %s4151_s10 = scalar_lea.vmem %s3667_s14, 32 }
 0x3ea   :  { %v2924_v3 = vcombine.low %v2908_v26, %v2922_v42  ;;  %v4096_v26 = vld [vmem:[%s5250_s9 + $0x20] sm:$0xff]   ;;  %v4097_v42 = vld [vmem:[%s5250_s9 + $0x18] sm:$0xff]   ;;  %p4152_p0 = scmp.ne.s32.totalorder %s3667_s14, %s4151_s10  ;;  %p4157_p2 = scmp.lt.s32.totalorder %s4151_s10, %s4151_s10 }
 0x3ec   :  { %3802 = vmatprep.mubr.msk.bf16.mxu1 %vm629_vm0, %v2924_v3  ;;  %3864 = vmatpush3.bf16.msra.mxu0 %v4092_v14  ;;  %v4098_v3 = vld [vmem:[%s5250_s9 + $0x10] sm:$0xff]   ;;  %p4158_p3 = por %p4157_p2, %p4156_p1 }
 0x3ed   :  { %3022 = vmatmul.mubr.bf16.vlgmr.msra.gmra.mxu1 %v2923_v4  ;;  %v4099_v4 = vld [vmem:[%s5250_s9 + $0x8] sm:$0xff]  }
 0x3ee   :  { %3399 = vmatpush1.bf16.msra.mxu1 %v4068_v5  ;;  %v4100_v5 = vld [vmem:[%s5250_s9] sm:$0xff]   ;;  %p4159_p4 = pnand %p4158_p3, %p4152_p0 }
 0x3ef   :  { %3400 = vmatprep.subr.bf16.mxu1 %v4177_v51 }
 0x3f2   :  { %3401 = vmatpush1.bf16.msra.mxu1 %v4070_v52  ;;  %v3804_v52 = vld [vmem:[%s5249_s8] ss:$0 sm:$0xff] }
 0x3f3   :  { %3402 = vmatprep.subr.bf16.mxu1 %v4177_v51 }
 0x3f6   :  { %3403 = vmatpush1.bf16.msra.mxu1 %v4073_v9 }
 0x3f7   :  { %3404 = vmatprep.subr.bf16.mxu1 %v4177_v51 }
 0x3fa   :  { %3405 = vmatpush1.bf16.msra.mxu1 %v4076_v13 }
 0x3fb   :  { %3406 = vmatprep.subr.bf16.mxu1 %v4177_v51 }
 0x3fe   :  { %3407 = vmatpush1.bf16.msra.mxu1 %v4079_v22 }
 0x3ff   :  { %3408 = vmatprep.subr.bf16.mxu1 %v4177_v51 }
 0x402   :  { %3409 = vmatpush1.bf16.msra.mxu1 %v4082_v18 }
 0x403   :  { %3410 = vmatprep.subr.bf16.mxu1 %v4177_v51 }
 0x406   :  { %3411 = vmatpush1.bf16.msra.mxu1 %v4085_v1  ;;  %v3617_v1 = vsel %vm2500_vm5, %v4101_v41, 0 }
 0x407   :  { %3412 = vmatprep.subr.bf16.mxu1 %v4177_v51 }
 0x40a   :  { %3413 = vmatpush1.bf16.msra.mxu1 %v4088_v17  ;;  %v4103_v17 = vld [vmem:[%s5252_s11 + $0x18] sm:$0xff]  }
 0x40b   :  { %3428 = vmatprep.subr.bf16.mxu1 %v4177_v51 }
 0x40e   :  { %3429 = vmatpush2.bf16.msra.mxu1 %v4091_v31 }
 0x4ad   :  { %v3023_v25 = vpop.f32.mrf.mxu1 }
 0x4af   :  { %v3025_v27 = vpop.f32.mrf.mxu1 }
 0x4b0   :  { %v4105_v27 = vld [vmem:[%s5252_s11 + $0x8] sm:$0xff]  }
 0x4b1   :  { %v3026_v28 = vpop.f32.mrf.mxu1 }
 0x4b2   :  { %v3030_v32 = vpack.c.bf16 %v3026_v28, %v3023_v25  ;;  %v3803_v12 = vpack.c.bf16 %v3026_v28, %v3026_v28  ;;  %v4104_v25 = vld [vmem:[%s5252_s11 + $0x10] sm:$0xff]   ;;  %v4106_v28 = vld [vmem:[%s5252_s11] sm:$0xff]  }
 0x4b3   :  { %v3028_v63 = vpop.f32.mrf.mxu1 }
 0x4b4   :  { %v3039_v51 = vrot.slane %v3030_v32, %v4323_v36  ;;  %v3046_v34 = vrot.slane %v3803_v12, %v4323_v36 }
 0x4b6   :  { %v3047_v35 = vcombine.high %v3039_v51, %v3039_v51  ;;  %v3054_v37 = vrot.slane %v3039_v51, %v4323_v36  ;;  %v3061_v38 = vrot.slane %v3046_v34, %v4323_v36 }
 0x4b8   :  { %v3068_v39 = vrot.slane %v3047_v35, %v4323_v36  ;;  %v3069_v49 = vcombine.high %v3054_v37, %v3054_v37  ;;  %v3125_v56 = vrot.slane %v3061_v38, %v4323_v36 }
 0x4ba   :  { %v3093_v50 = vrot.slane %v3069_v49, %v4323_v36  ;;  %v3077_v45 = vrot.slane %v3068_v39, %v4323_v36  ;;  %v3070_v55 = vcombine.high %v3068_v39, %v3068_v39  ;;  %v3132_v57 = vrot.slane %v3125_v56, %v4323_v36  ;;  %v3841_v39 = vld [vmem:[%s5253_s12] ss:$0 sm:$0xff] }
 0x4bc   :  { %v3100_v21 = vrot.slane %v3093_v50, %v4323_v36  ;;  %v3084_v33 = vrot.slane %v3077_v45, %v4323_v36  ;;  %v3109_v53 = vrot.slane %v3070_v55, %v4323_v36 }
 0x4be   :  { %3101 = vrot.lane.b32.xlu1 %v3100_v21, %s4174_s17  ;;  %3085 = vrot.lane.b32.xlu0 %v3084_v33, %s4182_s18  ;;  %v3116_v59 = vrot.slane %v3109_v53, %v4323_v36  ;;  %v4184_v36 = vmov 0.0  }
 0x4bf   :  { %3887 = vmatprep.subr.bf16.mxu0 %v4184_v36  ;;  %3907 = vmatprep.subr.bf16.mxu1 %v4184_v36 }
 0x4c2   :  { %3133 = vrot.lane.b32.xlu1 %v3132_v57, %s4176_s27  ;;  %3117 = vrot.lane.b32.xlu0 %v3116_v59, %s4183_s7 }
 0x530   :  { %v3102_v60 = vpop.permute.xlu1 %3101  ;;  %v3086_v61 = vpop.permute.xlu0 %3085 }
 0x531   :  { %v3140_v62 = vsel %vm629_vm0, %v3086_v61, %v3102_v60  ;;  %v3137_v19 = vsel %vm2158_vm8, %v3054_v37, %v3086_v61 }
 0x534   :  { %v3134_v0 = vpop.permute.xlu1 %3133  ;;  %v3118_v24 = vpop.permute.xlu0 %3117 }
 0x535   :  { %v3146_v44 = vsel %vm642_vm1, %v3118_v24, %v3134_v0  ;;  %3830 = vmatprep.mubr.msk.bf16.mxu1 %vm3355_vm10, %v3134_v0  ;;  %v3143_v58 = vsel %vm3141_vm11, %v3140_v62, %v3118_v24 }
 0x536   :  { %3390 = vmatprep.mubr.bf16.mxu0 %v3143_v58  ;;  %3431 = vmatmul.mubr.bf16.vlgmr.msra.gmra.mxu1 %v3146_v44 }
 0x537   :  { %3391 = vmatmul.mubr.bf16.vlgmr.msra.gmra.mxu0 %v3137_v19  ;;  %3919 = vmatprep.mubr.msk.bf16.mxu1 %vm4185_vm12, %v4184_v36 }
 0x538   :  { %3888 = vmatpush3.bf16.msra.mxu0 %v3515_v43  ;;  %3903 = vmatprep.mubr.msk.bf16.mxu0 %vm4185_vm12, %v4184_v36 }
 0x539   :  { %3889 = vmatprep.subr.bf16.mxu0 %v4184_v36  ;;  %3908 = vmatpush3.bf16.msra.mxu1 %v3617_v1 }
 0x53a   :  { %3909 = vmatprep.subr.bf16.mxu1 %v4184_v36 }
 0x53c   :  { %3890 = vmatpush3.bf16.msra.mxu0 %v4094_v47 }
 0x53d   :  { %3891 = vmatprep.subr.bf16.mxu0 %v4184_v36  ;;  %3910 = vmatpush3.bf16.msra.mxu1 %v4102_v2 }
 0x53e   :  { %3911 = vmatprep.subr.bf16.mxu1 %v4184_v36 }
 0x540   :  { %3892 = vmatpush3.bf16.msra.mxu0 %v4095_v54 }
 0x541   :  { %3893 = vmatprep.subr.bf16.mxu0 %v4184_v36  ;;  %3912 = vmatpush3.bf16.msra.mxu1 %v4103_v17 }
 0x542   :  { %3913 = vmatprep.subr.bf16.mxu1 %v4184_v36 }
 0x544   :  { %3894 = vmatpush3.bf16.msra.mxu0 %v4096_v26 }
 0x545   :  { %3895 = vmatprep.subr.bf16.mxu0 %v4184_v36  ;;  %3914 = vmatpush3.bf16.msra.mxu1 %v4104_v25 }
 0x546   :  { %3915 = vmatprep.subr.bf16.mxu1 %v4184_v36 }
 0x548   :  { %3896 = vmatpush3.bf16.msra.mxu0 %v4097_v42 }
 0x549   :  { %3897 = vmatprep.subr.bf16.mxu0 %v4184_v36  ;;  %3916 = vmatpush3.bf16.msra.mxu1 %v4105_v27 }
 0x54a   :  { %3917 = vmatprep.subr.bf16.mxu1 %v4184_v36 }
 0x54c   :  { %3898 = vmatpush3.bf16.msra.mxu0 %v4098_v3 }
 0x54d   :  { %3899 = vmatprep.subr.bf16.mxu0 %v4184_v36  ;;  %3918 = vmatpush3.bf16.msra.mxu1 %v4106_v28 }
 0x550   :  { %3900 = vmatpush3.bf16.msra.mxu0 %v4099_v4 }
 0x551   :  { %3901 = vmatprep.subr.bf16.mxu0 %v4184_v36 }
 0x554   :  { %3902 = vmatpush3.bf16.msra.mxu0 %v4100_v5 }
 0x5f6   :  { %v3432_v6 = vpop.f32.mrf.mxu1 }
 0x5f7   :  { %v3865_v7 = vpop.f32.mrf.mxu0 }
 0x5f8   :  { %v3434_v40 = vpop.f32.mrf.mxu1 }
 0x5f9   :  { %v3866_v46 = vpop.f32.mrf.mxu0 }
 0x5fa   :  { %v3867_v8 = vadd.f32 %v3866_v46, %v3865_v7  ;;  %v3435_v9 = vpop.f32.mrf.mxu1 }
 0x5fb   :  { %v3868_v10 = vpop.f32.mrf.mxu0 }
 0x5fc   :  { %v3393_v11 = vadd.f32 %v3867_v8, %v3804_v52  ;;  %v3436_v13 = vpop.f32.mrf.mxu1 }
 0x5fd   :  { %v3869_v15 = vpop.f32.mrf.mxu0 }
 0x5fe   :  { %v3433_v16 = vadd.f32 %v3432_v6, %v3393_v11 }
 0x600   :  { %v3438_v22 = vmul.f32 0.5, %v3433_v16 }
 0x602   :  { %4147 = vtanh.f32 %v3438_v22 }
 0x60f   :  { %v4148_v23 = vpop.eup %4147 }
 0x610   :  { %v3440_v48 = vmul.f32 0.5, %v4148_v23 }
 0x612   :  { %v3441_v18 = vadd.f32 0.5, %v3440_v48 }
 0x614   :  { %v3442_v29 = vpack.c.bf16 %v3441_v18, %v3441_v18 }
 0x616   :  { %3904 = vmatmul.mubr.msk.bf16.vlgmr.msra.gmra.mxu0 %vm3510_vm13, %v3442_v29 }
 0x6d6   :  { %v3551_v31 = vpop.f32.mrf.mxu0 }
 0x6d7   :  { %v3552_v14 = vadd.f32 %v3831_v30, %v3551_v31 }
 0x6d8   :  { %v3905_v32 = vpop.f32.mrf.mxu0 }
 0x6d9   :  { %v3557_v12 = vmul.f32 0.5, %v3552_v14 }
 0x6da   :  { %v3554_v63 = vpop.f32.mrf.mxu0 }
 0x6db   :  { %4149 = vtanh.f32 %v3557_v12 }
 0x6dc   :  { %v3906_v51 = vpop.f32.mrf.mxu0 }
 0x6e8   :  { %v4150_v34 = vpop.eup %4149 }
 0x6e9   :  { %v3559_v35 = vmul.f32 0.5, %v4150_v34 }
 0x6eb   :  { %v3560_v37 = vadd.f32 0.5, %v3559_v35 }
 0x6ed   :  { %v3561_v38 = vpack.c.bf16 %v3560_v37, %v3560_v37 }
 0x6ef   :  { %3920 = vmatmul.mubr.msk.bf16.vlgmr.msra.gmra.mxu1 %vm2138_vm7, %v3561_v38 }
 0x7af   :  { %v3653_v49 = vpop.f32.mrf.mxu1 }
 0x7b0   :  { %v3654_v50 = vadd.f32 %v3841_v39, %v3653_v49 }
 0x7b1   :  { %v3921_v45 = vpop.f32.mrf.mxu1 }
 0x7b2   :  { %3659 = vst [vmem:[#allocation2] sm:$0x3] %v3654_v50 }
 0x7b3   :  { %v3656_v55 = vpop.f32.mrf.mxu1 }
 0x7b4   :  { %4162 = shalt.err (!%p4159_p4)
}
 0x7b5   :  { %3669 = dma.vmem_to_hbm [thread:$0]  %s3667_s14, 32, %s5254_s13, [#allocation3]   ;;  %v3922_v21 = vpop.f32.mrf.mxu1 }
 0x7b6   :  { %4171 = dma.done.wait [#allocation3], 32  }
 0x7b7   :  { %4172 = vsyncadd [#allocation3], 4294967264 }
 0x7b8   :  { %3673 = vsyncpa [#allocation3], 1 }

</bundles_post_ra>
